<compile_context>
chip_gen: v5e
topology: v5e:2x2
jax: 0.10.0
libtpu: 0.0.40
codegen_flags: <defaults>
</compile_context>

<pallas_src>
import jax
import jax.numpy as jnp
from jax.experimental import pallas as pl
from jax.experimental.pallas import tpu as pltpu


def _round_up(x, m):
    return ((x + m - 1) // m) * m


def iwt_kernel(x_ref, h_ref):
    """One grid step: a (channel-block, row-block) tile of the inverse wavelet transform.

    x_ref: (4, cb, hb, W)   -- 4 wavelet sub-bands for cb output channels, hb input rows
    h_ref: (cb, 2*hb, 2*W)  -- corresponding output tile (full width)
    """
    x = x_ref[...].astype(jnp.float32) * 0.5
    x1, x2, x3, x4 = x[0], x[1], x[2], x[3]

    # 4-point butterfly: 8 adds instead of 12, fewer live f32 intermediates.
    t1 = x1 + x2
    t2 = x1 - x2
    t3 = x3 + x4
    t4 = x3 - x4
    e00 = t2 - t4   # h[0::2, 0::2] = x1 - x2 - x3 + x4
    e10 = t2 + t4   # h[1::2, 0::2] = x1 - x2 + x3 - x4
    e01 = t1 - t3   # h[0::2, 1::2] = x1 + x2 - x3 - x4
    e11 = t1 + t3   # h[1::2, 1::2] = x1 + x2 + x3 + x4

    cb, hb, w = e00.shape
    # Width (lane) interleave at (hb, W) granularity: even cols <- e_r0, odd cols <- e_r1.
    even = jnp.stack([e00, e01], axis=-1).reshape(cb, hb, 2 * w)   # even output rows
    odd = jnp.stack([e10, e11], axis=-1).reshape(cb, hb, 2 * w)    # odd output rows
    # Row interleave: (cb, hb, 2, 2W) -> (cb, 2hb, 2W) keeps the lane dim, i.e. it is a
    # sublane-only relayout.  The old full (c, H, 2, 2W) -> (c, 4HW) lane flatten is gone:
    # the output block already has the final spatial layout.
    out = jnp.stack([even, odd], axis=-2).reshape(cb, 2 * hb, 2 * w)
    h_ref[...] = out.astype(h_ref.dtype)
    # TODO(synk): if bundle dumps show the (.., W, 2) width-interleave temporaries
    # materializing as lane-padded VMEM arrays, replace the width interleave with an MXU
    # scatter-matmul (e_r0 @ S_even + e_r1 @ S_odd with 0/1 matrices) -- the MXU is idle here.


def _vmem_budget_bytes():
    """Generation-aware VMEM budget: ~3/4 of physical (48 MiB on v7x, 96 MiB on v5e/v6e)."""
    try:
        cap = int(pltpu.get_tpu_info().vmem_capacity_bytes)
    except Exception:
        cap = 64 * 1024 * 1024          # conservative: v7x physical VMEM
    return min((cap * 3) // 4, 96 * 1024 * 1024)


def _step_vmem_bytes(cb, hb, w, in_itemsize, out_itemsize):
    """Padding-aware per-step VMEM estimate: double-buffered I/O + f32 compute temporaries."""
    in_tile = 4 * cb * _round_up(hb, 8) * _round_up(w, 128) * in_itemsize
    out_tile = cb * _round_up(2 * hb, 8) * _round_up(2 * w, 128) * out_itemsize
    in_f32 = 4 * cb * _round_up(hb, 8) * _round_up(w, 128) * 4
    out_f32 = cb * _round_up(2 * hb, 8) * _round_up(2 * w, 128) * 4
    temps = in_f32 + 2 * out_f32        # butterfly planes + interleave temporaries
    return 2 * in_tile + 2 * out_tile + temps


def _useful_step_bytes(cb, hb, w, in_itemsize, out_itemsize):
    return 4 * cb * hb * w * in_itemsize + 4 * cb * hb * w * out_itemsize


def _choose_blocks(batch, oc, height, width, in_itemsize, out_itemsize, budget):
    """Pick (channel_block, h_block): big enough to amortize per-step overhead (~8-16 MiB of
    traffic), small enough to double-buffer in VMEM, with enough parallel grid steps for
    v7x's two TensorCores."""
    target = 12 * 1024 * 1024
    fit = budget - 4 * 1024 * 1024                       # headroom for internal scratch

    hb_opts = sorted({height} | {h for h in range(8, height, 8) if height % h == 0})
    cb_opts = [d for d in range(1, oc + 1) if oc % d == 0]

    def useful(cb, hb):
        return _useful_step_bytes(cb, hb, width, in_itemsize, out_itemsize)

    candidates = [(cb, hb) for cb in cb_opts for hb in hb_opts
                  if _step_vmem_bytes(cb, hb, width, in_itemsize, out_itemsize) <= fit]
    if not candidates:
        # TODO(synk): pathological (huge prime H with huge W) shapes would need a W-block
        # grid axis; fall back to the smallest expressible block.
        candidates = [(1, min(hb_opts))]

    reaching = [c for c in candidates if useful(*c) >= target]
    if reaching:
        cb, hb = min(reaching, key=lambda c: useful(*c))   # smallest block hitting target
    else:
        cb, hb = max(candidates, key=lambda c: useful(*c))  # largest block that fits

    def steps(cb_, hb_):
        return batch * (oc // cb_) * (height // hb_)

    # Keep >=2 steps per TensorCore (v7x has 2 TCs) plus some pipeline depth.
    while steps(cb, hb) < 8:
        smaller_h = [h for h in hb_opts if h < hb]
        smaller_c = [c for c in cb_opts if c < cb]
        if smaller_h:
            hb = max(smaller_h)
        elif smaller_c:
            cb = max(smaller_c)
        else:
            break
    return cb, hb


def iwt(x, *, out_dtype=jnp.float32, c_block=None, h_block=None):
    """x: (B, 4*OC, H, W) -> (B, OC, 2H, 2W) in out_dtype (default float32, like the ref)."""
    B, C, H, W = x.shape
    assert C % 4 == 0, "input channels must be divisible by 4"
    oc = C // 4

    # Free view: expose the band axis (channel dim is band-major in the reference).
    xr = x.reshape(B, 4, oc, H, W)

    budget = _vmem_budget_bytes()
    cb, hb = _choose_blocks(B, oc, H, W, x.dtype.itemsize,
                            jnp.dtype(out_dtype).itemsize, budget)
    if c_block is not None:
        cb = c_block
    if h_block is not None:
        hb = h_block
    assert oc % cb == 0, "channel block must divide OC"
    assert H % hb == 0, "row block must divide H"
    assert hb == H or hb % 8 == 0, "row block must be a multiple of 8 (or the full H)"

    grid = (B, oc // cb, H // hb)
    # TODO(synk): if the input DMA shows exposed latency at small blocks, add
    # pipeline_mode=pl.Buffered(3) on the input BlockSpec.

    return pl.pallas_call(
        iwt_kernel,
        out_shape=jax.ShapeDtypeStruct((B, oc, 2 * H, 2 * W), out_dtype),
        grid=grid,
        in_specs=[
            pl.BlockSpec(
                (pl.Squeezed(), 4, cb, hb, W),
                lambda b, c, h: (b, 0, c, h, 0),
            ),
        ],
        out_specs=pl.BlockSpec(
            (pl.Squeezed(), cb, 2 * hb, 2 * W),
            lambda b, c, h: (b, c, h, 0),
        ),
        compiler_params=pltpu.CompilerParams(
            dimension_semantics=("parallel", "parallel", "parallel"),
            vmem_limit_bytes=budget,
        ),
    )(xr)


def iwt_ref(x):
    """Pure-JAX reference mirroring the PyTorch iwt_init."""
    B, C, H, W = x.shape
    oc = C // 4
    xf = x.astype(jnp.float32)
    x1 = xf[:, 0:oc] / 2
    x2 = xf[:, oc:2 * oc] / 2
    x3 = xf[:, 2 * oc:3 * oc] / 2
    x4 = xf[:, 3 * oc:4 * oc] / 2
    h = jnp.zeros((B, oc, 2 * H, 2 * W), jnp.float32)
    h = h.at[:, :, 0::2, 0::2].set(x1 - x2 - x3 + x4)
    h = h.at[:, :, 1::2, 0::2].set(x1 - x2 + x3 - x4)
    h = h.at[:, :, 0::2, 1::2].set(x1 + x2 - x3 - x4)
    h = h.at[:, :, 1::2, 1::2].set(x1 + x2 + x3 + x4)
    return h


if __name__ == "__main__":
    # IWT has no learnable parameters; deterministic input only.
    key = jax.random.PRNGKey(0)
    B, C, H, W = 2, 4, 16, 16          # output: (2, 1, 32, 32)
    x = jax.random.normal(key, (B, C, H, W), dtype=jnp.float32)

    out = jax.block_until_ready(iwt(x))
    ref = iwt_ref(x)

    assert out.shape == (B, C // 4, 2 * H, 2 * W)
    assert out.dtype == jnp.float32
    # Tolerance allows only for add-reordering (butterfly) ulp differences.
    assert jnp.allclose(out, ref, atol=1e-5, rtol=1e-5)

    print("KERNEL_OK")
</pallas_src>

<mosaic_0001>
module attributes {stable_mosaic.version = 11 : i64} {
  func.func @iwt_kernel(%arg0: i32, %arg1: i32, %arg2: i32, %arg3: memref<1x4x1x8x16xf32, #tpu.memory_space<vmem>>, %arg4: memref<1x1x16x32xf32, #tpu.memory_space<vmem>>) attributes {dimension_semantics = [#tpu.dimension_semantics<parallel>, #tpu.dimension_semantics<parallel>, #tpu.dimension_semantics<parallel>], iteration_bounds = array<i64: 2, 1, 2>, scalar_prefetch = 0 : i64, scratch_operands = 0 : i64, tpu.core_type = #tpu.core_type<tc>, window_params = [{transform_indices = @transform_0, window_bounds = array<i64: 1, 4, 1, 8, 16>}, {transform_indices = @transform_1, window_bounds = array<i64: 1, 1, 16, 32>}]} {
    %c0 = arith.constant 0 : index
    %c0_0 = arith.constant 0 : index
    %c0_1 = arith.constant 0 : index
    %c0_2 = arith.constant 0 : index
    %c0_3 = arith.constant 0 : index
    %0 = vector.load %arg3[%c0, %c0_0, %c0_1, %c0_2, %c0_3] : memref<1x4x1x8x16xf32, #tpu.memory_space<vmem>>, vector<1x4x1x8x16xf32>
    %1 = vector.shape_cast %0 : vector<1x4x1x8x16xf32> to vector<4x1x8x16xf32>
    %cst = arith.constant 5.000000e-01 : f32
    %2 = vector.broadcast %cst : f32 to vector<4x1x8x16xf32>
    %3 = arith.mulf %1, %2 : vector<4x1x8x16xf32>
    %4 = vector.extract_strided_slice %3 {offsets = [0, 0, 0, 0], sizes = [1, 1, 8, 16], strides = [1, 1, 1, 1]} : vector<4x1x8x16xf32> to vector<1x1x8x16xf32>
    %5 = vector.shape_cast %4 : vector<1x1x8x16xf32> to vector<1x8x16xf32>
    %6 = vector.extract_strided_slice %3 {offsets = [1, 0, 0, 0], sizes = [1, 1, 8, 16], strides = [1, 1, 1, 1]} : vector<4x1x8x16xf32> to vector<1x1x8x16xf32>
    %7 = vector.shape_cast %6 : vector<1x1x8x16xf32> to vector<1x8x16xf32>
    %8 = vector.extract_strided_slice %3 {offsets = [2, 0, 0, 0], sizes = [1, 1, 8, 16], strides = [1, 1, 1, 1]} : vector<4x1x8x16xf32> to vector<1x1x8x16xf32>
    %9 = vector.shape_cast %8 : vector<1x1x8x16xf32> to vector<1x8x16xf32>
    %10 = vector.extract_strided_slice %3 {offsets = [3, 0, 0, 0], sizes = [1, 1, 8, 16], strides = [1, 1, 1, 1]} : vector<4x1x8x16xf32> to vector<1x1x8x16xf32>
    %11 = vector.shape_cast %10 : vector<1x1x8x16xf32> to vector<1x8x16xf32>
    %12 = arith.addf %5, %7 : vector<1x8x16xf32>
    %13 = arith.subf %5, %7 : vector<1x8x16xf32>
    %14 = arith.addf %9, %11 : vector<1x8x16xf32>
    %15 = arith.subf %9, %11 : vector<1x8x16xf32>
    %16 = arith.subf %13, %15 : vector<1x8x16xf32>
    %17 = arith.addf %13, %15 : vector<1x8x16xf32>
    %18 = arith.subf %12, %14 : vector<1x8x16xf32>
    %19 = arith.addf %12, %14 : vector<1x8x16xf32>
    %20 = vector.shape_cast %16 : vector<1x8x16xf32> to vector<1x8x16x1xf32>
    %21 = vector.shape_cast %18 : vector<1x8x16xf32> to vector<1x8x16x1xf32>
    %22 = tpu.concatenate %20, %21 in 3 : vector<1x8x16x1xf32>, vector<1x8x16x1xf32> -> vector<1x8x16x2xf32>
    %23 = vector.shape_cast %22 : vector<1x8x16x2xf32> to vector<1x8x32xf32>
    %24 = vector.shape_cast %17 : vector<1x8x16xf32> to vector<1x8x16x1xf32>
    %25 = vector.shape_cast %19 : vector<1x8x16xf32> to vector<1x8x16x1xf32>
    %26 = tpu.concatenate %24, %25 in 3 : vector<1x8x16x1xf32>, vector<1x8x16x1xf32> -> vector<1x8x16x2xf32>
    %27 = vector.shape_cast %26 : vector<1x8x16x2xf32> to vector<1x8x32xf32>
    %28 = vector.shape_cast %23 : vector<1x8x32xf32> to vector<1x8x1x32xf32>
    %29 = vector.shape_cast %27 : vector<1x8x32xf32> to vector<1x8x1x32xf32>
    %30 = tpu.concatenate %28, %29 in 2 : vector<1x8x1x32xf32>, vector<1x8x1x32xf32> -> vector<1x8x2x32xf32>
    %31 = vector.shape_cast %30 : vector<1x8x2x32xf32> to vector<1x16x32xf32>
    %c0_4 = arith.constant 0 : index
    %c0_5 = arith.constant 0 : index
    %c0_6 = arith.constant 0 : index
    %c0_7 = arith.constant 0 : index
    %32 = vector.load %arg4[%c0_4, %c0_5, %c0_6, %c0_7] : memref<1x1x16x32xf32, #tpu.memory_space<vmem>>, vector<1x1x16x32xf32>
    %33 = vector.shape_cast %32 : vector<1x1x16x32xf32> to vector<1x16x32xf32>
    %34 = vector.shape_cast %31 : vector<1x16x32xf32> to vector<1x1x16x32xf32>
    tpu.vector_store %arg4[%c0_4, %c0_5, %c0_6, %c0_7], %34 {strides = array<i32>} : memref<1x1x16x32xf32, #tpu.memory_space<vmem>>, vector<1x1x16x32xf32>,
    return
  }
  func.func @transform_0(%arg0: i32, %arg1: i32, %arg2: i32) -> (i32, i32, i32, i32, i32) {
    %c0_i32 = arith.constant 0 : i32
    %c0_i32_0 = arith.constant 0 : i32
    %c0_i32_1 = arith.constant 0 : i32
    return %arg0, %c0_i32, %arg1, %arg2, %c0_i32_0 : i32, i32, i32, i32, i32
  }
  func.func @transform_1(%arg0: i32, %arg1: i32, %arg2: i32) -> (i32, i32, i32, i32) {
    %c0_i32 = arith.constant 0 : i32
    %c0_i32_0 = arith.constant 0 : i32
    return %arg0, %arg1, %arg2, %c0_i32 : i32, i32, i32, i32
  }
}

</mosaic_0001>

<bundles_post_ra>
// kernel: tpu_custom_call.1
= control target key start
LH: loop header
LB: loop body
LE: loop exit
PB: predicated region body
PF: predicated region fallthrough
CT: control target
= control target key end

     0   :  { %6 = vsyncpa [#allocation3], 0  ;;  %s6146_s0 = inlined_call_operand.hbm [shape: f32[2,4,1,16,16], index: 0, kind: input, shape index: {}]   ;;  %s6147_s1 = inlined_call_operand.hbm [shape: f32[2,1,32,32], index: 1, kind: output, shape index: {}]  }
   0x1   :  { %8 = vsyncpa [#allocation3 + $0x1], 0 }
   0x2   :  { %9 = vsyncpa [#allocation4], 0 }
   0x3   :  { %11 = vsyncpa [#allocation4 + $0x1], 0  ;;  %s3549_s6 = smov 0   ;;  %s3551_s7 = smov 0  }
   0x4   :  { %s3553_s8 = smov 0   ;;  %s3555_s9 = smov 0  }
   0x5   :  { %s3557_s10 = smov 0   ;;  %s3559_s11 = smov 0  }
   0x6   :  { %s3561_s12 = smov 0   ;;  %s3563_s13 = smov 0  }
   0x7 LB: > { %s3244_s14 = sadd.s32 4294967295, %s3516_s13   ;;  %s3245_s15 = sadd.s32 4294967294, %s3516_s13   ;;  %s3516_s13 = sphi %s3563_s13, %s17_s13   ;;  %s3512_s12 = sphi %s3561_s12, %s6390_s12   ;;  %s3508_s11 = sphi %s3559_s11, %s6389_s11   ;;  %s3504_s10 = sphi %s3557_s10, %s6388_s10   ;;  %s3500_s9 = sphi %s3555_s9, %s6387_s9   ;;  %s3496_s8 = sphi %s3553_s8, %s6386_s8   ;;  %s3492_s7 = sphi %s3551_s7, %s6385_s7   ;;  %s3488_s6 = sphi %s3549_s6, %s6384_s6  }
   0x8   : > { %s29_s16 = sadd.s32 1, %s3508_s11  ;;  %s36_s17 = sadd.s32 1, %s3512_s12 }
   0x9   : > { %p30_p0 = scmp.ge.s32.totalorder %s29_s16, 2  ;;  %s47_s18 = sadd.s32 1, %s3496_s8 }
   0xa   : > { %p54_p1 = scmp.ne.s32.totalorder %s3496_s8, %s3492_s7  ;;  %p55_p2 = scmp.eq.s32.totalorder %s3516_s13, 0 }
   0xb   : > { %s6392_s16 = smov (%p30_p0, %s29_s16), 0  ;;  %s6394_s17 = smov (!%p30_p0, %s36_s17), %s3512_s12 }
   0xc   : > { %s43_s19 = ssub.s32 %s3508_s11, %s6392_s16  ;;  %p3602_p3 = por %p55_p2, %p54_p1 }
   0xd   : > { %p38_p4 = scmp.ge.s32.totalorder %s6394_s17, 2  ;;  %p60_p5 = scmp.ne.s32.totalorder %s3492_s7, %s3488_s6 }
   0xe   : > { %p61_p6 = scmp.eq.s32.totalorder %s3244_s14, 0  ;;  %p88_p7 = scmp.eq.s32.totalorder %s3244_s14, 3 }
   0xf   : > { %s6396_s17 = smov (%p38_p4, %s6394_s17), 0  ;;  %p94_p10 = scmp.eq.s32.totalorder %s3245_s15, 3 }
  0x10   : > { %6170 = sst [smem:[#allocation8_spill]] %s6396_s17  ;;  %p3610_p8 = por %p61_p6, %p60_p5 }
  0x11   : > { %p3614_p9 = por %p88_p7, %p54_p1  ;;  %s40_s23 = ssub.s32 %s3512_s12, %s6396_s17 }
  0x12   : > { %s44_s24 = sor.u32 %s43_s19, %s40_s23  ;;  %p3620_p12 = por %p94_p10, %p60_p5 }
  0x13   : > { %p45_p11 = scmp.eq.s32.totalorder %s44_s24, 0  ;;  %p3272_p13 = scmp.lt.s32.totalorder %s3516_s13, 4 }
  0x14   : > { %s114_s26 = sand.u32 1, %s3496_s8   ;;  %s3249_s29 = sshll.u32 %s3512_s12, 3 }
  0x15   : > { %s3627_s27 = scalar_select %p45_p11, %s3496_s8, %s47_s18  }
  0x16   : > { %s3248_s28 = sshll.u32 %s114_s26, 5  ;;  %s124_s30 = sadd.s32 %s3508_s11, %s3249_s29 }
  0x17   : > { %s118_s2 = scalar_lea.vmem [#allocation2], %s3248_s28  ;;  %s3250_s4 = sshll.u32 %s124_s30, 3 }
  0x18   : > { %s129_s3 = sshll.u32 %s118_s2, 4  ;;  %s126_s15 = scalar_lea.hbm %s6146_s0, %s3250_s4  ;;  %s130_s3 = int_to_ptr.vmem [resolvable:$true] %s129_s3 }
  0x19   : > { %p3265_p0 = pnand %p3272_p13, %p3602_p3  ;;  %s127_s19 = sshll.u32 %s126_s15, 4  ;;  %s128_s19 = int_to_ptr.hbm [resolvable:$true] %s127_s19 }
  0x1a   : > { %s115_s23 = scalar_lea.sflag [#allocation3], %s114_s26  ;;  %s3518_s18 = smov 256  }
  0x1b   : > { %s3519_s24 = smov 128   ;;  %s3520_s17 = smov 8  }
  0x1c   : > { %3267 = dma.hbm_to_vmem [thread:$0]  (!%p3265_p0), %s128_s19, 512, %s130_s3, %s115_s23, %s3518_s18, %s3519_s24, %s3520_s17  }
  0x1d   : > { %p3251_p1 = scmp.ge.s32.totalorder %s3516_s13, 1  ;;  %p137_p2 = scmp.lt.s32.totalorder %s3516_s13, 5 }
  0x1f   : > { %p138_p4 = pnand %p3251_p1, %p137_p2 }
  0x21   : > { %141 = sbr.rel (%p138_p4) target bundleno = 1129 (0x469), region = 24 }
  0x26   : > { %s3639_s28 = sand.u32 1, %s3492_s7  }
  0x27   : > { %s3252_s29 = sshll.u32 %s3639_s28, 5  ;;  %s144_s20 = scalar_lea.sflag [#allocation3], %s3639_s28 }
  0x28   : > { %s147_s30 = scalar_lea.vmem [#allocation2], %s3252_s29 }
  0x29   : > { %3479 = dma.done.wait (%p3610_p8), %s144_s20, 512  }
  0x2a   : > { %3481 = vsyncadd (%p3610_p8), %s144_s20, 4294966784  ;;  %v185_v0 = vlaneseq  ;;  %v168_v2 = vld [vmem:[%s147_s30] sm:$0xff]  ;;  %v169_v3 = vld [vmem:[%s147_s30 + $0x8] sm:$0xff]  ;;  %vm392_vm0 = vcmask 7168   ;;  %vm634_vm1 = vcmask 1047556   ;;  %s3523_s17 = smov 2  }
  0x2b   : > { %v170_v4 = vld [vmem:[%s147_s30 + $0x10] sm:$0xff]  ;;  %v171_v5 = vld [vmem:[%s147_s30 + $0x18] sm:$0xff]  ;;  %v172_v6 = vmul.f32 0.5, %v168_v2  ;;  %v173_v7 = vmul.f32 0.5, %v169_v3  ;;  %s3524_s21 = smov 4   ;;  %s3525_s26 = smov 6  }
  0x2c   : > { %v3647_v1 = vshrl.u32 %v185_v0, 7  ;;  %v174_v8 = vmul.f32 0.5, %v170_v4  ;;  %v175_v9 = vmul.f32 0.5, %v171_v5  ;;  %s3526_s2 = smov 8   ;;  %s3527_s3 = smov 10   ;;  %vm6166_vm2 = vcmask 15360  }
  0x2d   : > { %v177_v10 = vsub.f32 %v172_v6, %v173_v7  ;;  %v176_v18 = vadd.f32 %v173_v7, %v172_v6  ;;  %v3521_v6 = vmov 1983009808   ;;  %s3528_s4 = smov 12   ;;  %s3529_s5 = smov 14   ;;  %vm1731_vm3 = vcmask 31744  }
  0x2e   : > { %3362 = vset.pattern.permute.xlu2 %v3647_v1  ;;  %3360 = vset.pattern.permute.xlu1 %v3647_v1  ;;  %v179_v11 = vsub.f32 %v174_v8, %v175_v9  ;;  %v3653_v16 = vadd.s32 8, %v3647_v1  ;;  %v178_v19 = vadd.f32 %v175_v9, %v174_v8  ;;  %v637_v7 = vunpack.c.l.s4 %v3521_v6  ;;  %s3530_s14 = smov 16   ;;  %s3531_s15 = smov 18  }
  0x2f   : > { %3359 = vset.pattern.permute.xlu0 %v3647_v1  ;;  %v3522_v8 = vmov 1934713408   ;;  %s3532_s19 = smov 20   ;;  %s3533_s23 = smov 22   ;;  %vm1740_vm4 = vcmask 48128   ;;  %vm1749_vm5 = vcmask 64512  }
  0x30   : > { %v180_v12 = vsub.f32 %v177_v10, %v179_v11  ;;  %v3657_v20 = vsub.f32 %v176_v18, %v178_v19  ;;  %v3662_v24 = vadd.f32 %v179_v11, %v177_v10  ;;  %v3668_v26 = vadd.f32 %v178_v19, %v176_v18  ;;  %s3534_s18 = smov 24   ;;  %s3535_s24 = smov 26  }
  0x31   : > { %v647_v9 = vunpack.c.l.s4 %v3522_v8  ;;  %s3536_s29 = smov 28   ;;  %s3537_s20 = smov 30   ;;  %vm1758_vm6 = vcmask 80896   ;;  %vm1767_vm7 = vcmask 97280   ;;  %vm1776_vm8 = vcmask 113664  }
  0x32   : > { %v210_v13 = vperm.slane %v180_v12, 2  ;;  %v197_v14 = vperm.slane %v180_v12, 1  ;;  %v184_v15 = vperm.slane %v180_v12, 0  ;;  %v236_v17 = vperm.slane %v180_v12, 4  ;;  %s3253_s30 = sshll.u32 %s3639_s28, 4 }
  0x33   : > { %v301_v21 = vperm.slane %v3657_v20, 1  ;;  %v223_v22 = vperm.slane %v180_v12, 3  ;;  %v366_v23 = vperm.slane %v3657_v20, 6  ;;  %v448_v25 = vperm.slane %v3662_v24, 3 }
  0x34   : > { %v249_v27 = vperm.slane %v180_v12, 5  ;;  %v513_v28 = vperm.slane %v3668_v26, 0  ;;  %v262_v29 = vperm.slane %v180_v12, 6  ;;  %v578_v30 = vperm.slane %v3668_v26, 5 }
  0x35   : > { %v275_v31 = vperm.slane %v180_v12, 7  ;;  %v288_v32 = vperm.slane %v3657_v20, 0  ;;  %v327_v33 = vperm.slane %v3657_v20, 3  ;;  %v314_v34 = vperm.slane %v3657_v20, 2 }
  0x36   : > { %215 = vperm.xlu2 %3362, %v210_v13   ;;  %202 = vperm.xlu1 %3360, %v197_v14   ;;  %v409_v35 = vperm.slane %v3662_v24, 0  ;;  %v340_v36 = vperm.slane %v3657_v20, 4  ;;  %v353_v37 = vperm.slane %v3657_v20, 5  ;;  %v474_v39 = vperm.slane %v3662_v24, 5 }
  0x37   : > { %189 = vperm.xlu0 %3359, %v184_v15   ;;  %v379_v40 = vperm.slane %v3657_v20, 7  ;;  %v539_v42 = vperm.slane %v3668_v26, 2  ;;  %v422_v46 = vperm.slane %v3662_v24, 1  ;;  %v435_v48 = vperm.slane %v3662_v24, 2 }
  0x38   : > { %v461_v53 = vperm.slane %v3662_v24, 4  ;;  %v604_v56 = vperm.slane %v3668_v26, 7  ;;  %v487_v59 = vperm.slane %v3662_v24, 6  ;;  %v500_v62 = vperm.slane %v3662_v24, 7 }
  0x39   : > { %v526_v5 = vperm.slane %v3668_v26, 1  ;;  %v3750_v12 = vunpack.c.0.s8 %v637_v7  ;;  %vm1785_vm9 = vcmask 130048   ;;  %vm1794_vm10 = vcmask 146432  }
  0x3a   : > { %vm1803_vm11 = vcmask 162816   ;;  %vm1812_vm12 = vcmask 179200   ;;  %vm1821_vm13 = vcmask 195584   ;;  %vm1830_vm14 = vcmask 211968  }
  0x3b   : > { %vm6167_vm15 = vcmask 228352  }
  0x3e   : > { %3363 = vset.pattern.permute.xlu2 %v3653_v16  ;;  %3361 = vset.pattern.permute.xlu1 %v3653_v16 }
  0x3f   : > { %241 = vperm.xlu0 %3359, %v236_v17  }
  0x46   : > { %221 = vperm.xlu2 %3363, %v210_v13   ;;  %208 = vperm.xlu1 %3361, %v197_v14  }
  0x47   : > { %306 = vperm.xlu0 %3359, %v301_v21  }
  0x4e   : > { %234 = vperm.xlu2 %3363, %v223_v22   ;;  %3364 = vset.pattern.permute.xlu1 %v3647_v1 }
  0x4f   : > { %371 = vperm.xlu0 %3359, %v366_v23  }
  0x56   : > { %3366 = vset.pattern.permute.xlu2 %v3647_v1  ;;  %228 = vperm.xlu1 %3364, %v223_v22  }
  0x57   : > { %453 = vperm.xlu0 %3359, %v448_v25  }
  0x5e   : > { %254 = vperm.xlu2 %3366, %v249_v27   ;;  %3365 = vset.pattern.permute.xlu1 %v3653_v16 }
  0x5f   : > { %518 = vperm.xlu0 %3359, %v513_v28  }
  0x66   : > { %267 = vperm.xlu2 %3366, %v262_v29   ;;  %247 = vperm.xlu1 %3365, %v236_v17   ;;  %v3758_v17 = vunpack.c.0.s8 %v647_v9 }
  0x67   : > { %583 = vperm.xlu0 %3359, %v578_v30  }
  0x6e   : > { %3368 = vset.pattern.permute.xlu2 %v3653_v16  ;;  %260 = vperm.xlu1 %3365, %v249_v27  }
  0x6f   : > { %3385 = vset.pattern.permute.xlu0 %v3653_v16 }
  0x76   : > { %286 = vperm.xlu2 %3368, %v275_v31   ;;  %3367 = vset.pattern.permute.xlu1 %v3647_v1 }
  0x77   : > { %195 = vperm.xlu0 %3385, %v184_v15  }
  0x7e   : > { %280 = vperm.xlu1 %3367, %v275_v31   ;;  %299 = vperm.xlu2 %3368, %v288_v32  }
  0x7f   : > { %273 = vperm.xlu0 %3385, %v262_v29  }
  0x86   : > { %3370 = vset.pattern.permute.xlu2 %v3647_v1  ;;  %293 = vperm.xlu1 %3367, %v288_v32  }
  0x87   : > { %338 = vperm.xlu0 %3385, %v327_v33  }
  0x8e   : > { %319 = vperm.xlu2 %3370, %v314_v34   ;;  %3369 = vset.pattern.permute.xlu1 %v3653_v16 }
  0x8f   : > { %420 = vperm.xlu0 %3385, %v409_v35  }
  0x90   : > { %v3690_v38 = vpop.permute.xlu2 %215 }
  0x96   : > { %332 = vperm.xlu2 %3370, %v327_v33   ;;  %312 = vperm.xlu1 %3369, %v301_v21  }
  0x97   : > { %485 = vperm.xlu0 %3385, %v474_v39  }
  0x9e   : > { %3372 = vset.pattern.permute.xlu2 %v3653_v16  ;;  %325 = vperm.xlu1 %3369, %v314_v34  }
  0x9f   : > { %550 = vperm.xlu0 %3385, %v539_v42  }
  0xa0   : > { %v3695_v41 = vpop.permute.xlu2 %221 }
  0xa6   : > { %351 = vperm.xlu2 %3372, %v340_v36   ;;  %3371 = vset.pattern.permute.xlu1 %v3647_v1 }
  0xa7   : > { %615 = vperm.xlu0 %3385, %v604_v56  }
  0xa8   : > { %v3701_v43 = vpop.permute.xlu2 %234  ;;  %v3704_v44 = vpop.permute.xlu1 %202 }
  0xa9   : > { %v190_v2 = vpop.permute.xlu0 %189 }
  0xae   : > { %364 = vperm.xlu2 %3372, %v353_v37   ;;  %345 = vperm.xlu1 %3371, %v340_v36  }
  0xb1   : > { %v242_v11 = vpop.permute.xlu0 %241 }
  0xb6   : > { %3374 = vset.pattern.permute.xlu2 %v3647_v1  ;;  %358 = vperm.xlu1 %3371, %v353_v37  }
  0xb8   : > { %v3706_v45 = vpop.permute.xlu2 %254  ;;  %v3710_v47 = vpop.permute.xlu1 %208 }
  0xbe   : > { %384 = vperm.xlu2 %3374, %v379_v40   ;;  %3373 = vset.pattern.permute.xlu1 %v3653_v16 }
  0xc0   : > { %v3713_v49 = vpop.permute.xlu2 %267 }
  0xc6   : > { %414 = vperm.xlu2 %3374, %v409_v35   ;;  %377 = vperm.xlu1 %3373, %v366_v23   ;;  %v552_v35 = vperm.slane %v3668_v26, 3 }
  0xc8   : > { %v3715_v50 = vpop.permute.xlu1 %228 }
  0xce   : > { %3376 = vset.pattern.permute.xlu2 %v3653_v16  ;;  %390 = vperm.xlu1 %3373, %v379_v40  }
  0xd0   : > { %v3717_v51 = vpop.permute.xlu2 %286 }
  0xd6   : > { %433 = vperm.xlu2 %3376, %v422_v46   ;;  %3375 = vset.pattern.permute.xlu1 %v3647_v1 }
  0xd8   : > { %v3720_v52 = vpop.permute.xlu1 %247  ;;  %v3724_v54 = vpop.permute.xlu2 %299 }
  0xde   : > { %446 = vperm.xlu2 %3376, %v435_v48   ;;  %427 = vperm.xlu1 %3375, %v422_v46  }
  0xe0   : > { %v3726_v55 = vpop.permute.xlu1 %260 }
  0xe6   : > { %3378 = vset.pattern.permute.xlu2 %v3647_v1  ;;  %440 = vperm.xlu1 %3375, %v435_v48   ;;  %v565_v48 = vperm.slane %v3668_v26, 4 }
  0xe8   : > { %v320_v57 = vpop.permute.xlu2 %319 }
  0xe9   : > { %v3784_v24 = vsel %vm392_vm0, %v3690_v38, %v320_v57 }
  0xea   : > { %v3789_v27 = vperm.slane %v3784_v24, %v3750_v12 }
  0xec   : > { %v796_v31 = vrot.slane %v3789_v27, 4 }
  0xee   : > { %466 = vperm.xlu2 %3378, %v461_v53   ;;  %3377 = vset.pattern.permute.xlu1 %v3653_v16  ;;  %v797_v38 = vsel %vm634_vm1, 0.0, %v796_v31 }
  0xef   : > { %v3813_v40 = vperm.slane %v797_v38, %v3758_v17 }
  0xf0   : > { %v281_v58 = vpop.permute.xlu1 %280  ;;  %v3735_v60 = vpop.permute.xlu2 %332 }
  0xf1   : > { %v3821_v46 = vsel %vm392_vm0, %v3715_v50, %v3735_v60 }
  0xf6   : > { %479 = vperm.xlu2 %3378, %v474_v39   ;;  %459 = vperm.xlu1 %3377, %v448_v25   ;;  %v307_v25 = vpop.permute.xlu0 %306 }
  0xf8   : > { %v294_v61 = vpop.permute.xlu1 %293 }
  0xf9   : > { %v3801_v34 = vsel %vm392_vm0, %v190_v2, %v294_v61 }
  0xfa   : > { %v639_v39 = vperm.slane %v3801_v34, %v3750_v12 }
  0xfe   : > { %3380 = vset.pattern.permute.xlu2 %v3653_v16  ;;  %472 = vperm.xlu1 %3377, %v461_v53   ;;  %v372_v36 = vpop.permute.xlu0 %371 }
  0xff   : > { %v3842_v2 = vsel %vm392_vm0, %v3713_v49, %v372_v36 }
 0x100   : > { %v3739_v63 = vpop.permute.xlu2 %351  ;;  %v1095_v6 = vperm.slane %v3842_v2, %v3750_v12 }
 0x106   : > { %498 = vperm.xlu2 %3380, %v487_v59   ;;  %3379 = vset.pattern.permute.xlu1 %v3647_v1  ;;  %v3825_v57 = vpop.permute.xlu0 %453 }
 0x108   : > { %v3741_v0 = vpop.permute.xlu1 %312  ;;  %v3743_v3 = vpop.permute.xlu2 %364 }
 0x10e   : > { %511 = vperm.xlu2 %3380, %v500_v62   ;;  %492 = vperm.xlu1 %3379, %v487_v59   ;;  %v3849_v8 = vpop.permute.xlu0 %518 }
 0x110   : > { %v3746_v4 = vpop.permute.xlu1 %325 }
 0x116   : > { %3382 = vset.pattern.permute.xlu2 %v3647_v1  ;;  %505 = vperm.xlu1 %3379, %v500_v62  }
 0x118   : > { %v385_v10 = vpop.permute.xlu2 %384 }
 0x119   : > { %v3753_v14 = vsel %vm392_vm0, %v281_v58, %v385_v10  ;;  %v867_v58 = vperm.slane %v3821_v46, %v3750_v12 }
 0x11a   : > { %v3766_v19 = vperm.slane %v3753_v14, %v3750_v12 }
 0x11b   : > { %v872_v60 = vrot.slane %v867_v58, 4 }
 0x11c   : > { %v3779_v22 = vperm.slane %v3766_v19, %v3758_v17 }
 0x11d   : > { %v873_v7 = vsel %vm634_vm1, 0.0, %v872_v60 }
 0x11e   : > { %531 = vperm.xlu2 %3382, %v526_v5   ;;  %3381 = vset.pattern.permute.xlu1 %v3653_v16  ;;  %6174 = vst [vmem:[#allocation9_spill] sm:$0xff] %v3779_v22  ;;  %v3853_v10 = vperm.slane %v873_v7, %v3758_v17 }
 0x120   : > { %v346_v13 = vpop.permute.xlu1 %345  ;;  %v3833_v62 = vpop.permute.xlu2 %414 }
 0x121   : > { %v3756_v15 = vsel %vm392_vm0, %v242_v11, %v346_v13  ;;  %v1100_v11 = vrot.slane %v1095_v6, 4  ;;  %v591_v13 = vperm.slane %v3668_v26, 6  ;;  %v3898_v26 = vperm.slane %v867_v58, %v3758_v17 }
 0x122   : > { %v3762_v18 = vperm.slane %v3756_v15, %v3750_v12 }
 0x123   : > { %6177 = vst [vmem:[#allocation12_spill] sm:$0xff] %v3898_v26 }
 0x124   : > { %v3770_v20 = vperm.slane %v3762_v18, %v3758_v17 }
 0x126   : > { %544 = vperm.xlu2 %3382, %v539_v42   ;;  %524 = vperm.xlu1 %3381, %v513_v28   ;;  %v968_v21 = vrot.slane %v3770_v20, 4  ;;  %v1196_v28 = vrot.slane %v3779_v22, 4 }
 0x128   : > { %v969_v23 = vsel %vm634_vm1, 0.0, %v968_v21  ;;  %v359_v29 = vpop.permute.xlu1 %358  ;;  %v1197_v32 = vsel %vm634_vm1, 0.0, %v1196_v28  ;;  %v894_v21 = vrot.slane %v3853_v10, 4 }
 0x129   : > { %1258 = vrot.lane.b32.xlu0 %v969_v23, %s3523_s17  ;;  %v3797_v33 = vsel %vm392_vm0, %v3706_v45, %v359_v29  ;;  %v644_v45 = vrot.slane %v639_v39, 4  ;;  %v395_v23 = vsel %vm392_vm0, %v3704_v44, %v307_v25 }
 0x12a   : > { %v3806_v37 = vperm.slane %v3797_v33, %v3750_v12  ;;  %v895_v28 = vsel %vm634_vm1, 0.0, %v894_v21  ;;  %v3869_v31 = vperm.slane %v395_v23, %v3750_v12  ;;  %v3926_v21 = vperm.slane %v3789_v27, %v3758_v17 }
 0x12b   : > { %v645_v59 = vsel %vm634_vm1, 0.0, %v644_v45 }
 0x12c   : > { %v1024_v42 = vrot.slane %v3806_v37, 4  ;;  %v3836_v50 = vperm.slane %v645_v59, %v3758_v17  ;;  %6179 = vst [vmem:[#allocation14_spill] sm:$0xff] %v3926_v21 }
 0x12e   : > { %3384 = vset.pattern.permute.xlu2 %v3653_v16  ;;  %537 = vperm.xlu1 %3381, %v526_v5   ;;  %v1025_v53 = vsel %vm634_vm1, 0.0, %v1024_v42  ;;  %v666_v5 = vrot.slane %v3836_v50, 4 }
 0x12f   : > { %v3831_v61 = vperm.slane %v1025_v53, %v3758_v17  ;;  %v938_v53 = vrot.slane %v3756_v15, 4 }
 0x130   : > { %v667_v9 = vsel %vm634_vm1, 0.0, %v666_v5  ;;  %v3856_v49 = vpop.permute.xlu2 %433 }
 0x131   : > { %1264 = vrot.lane.b32.xlu0 %v1197_v32, %s3523_s17  ;;  %6175 = vst [vmem:[#allocation10_spill] sm:$0xff] %v3856_v49  ;;  %v3871_v32 = vpop.permute.xlu0 %583  ;;  %v939_v15 = vsel %vm634_vm1, 0.0, %v938_v53 }
 0x132   : > { %v3917_v7 = vperm.slane %v939_v15, %v3750_v12  ;;  %v3958_v15 = vperm.slane %v3806_v37, %v3758_v17 }
 0x134   : > { %6180 = vst [vmem:[#allocation15_spill] sm:$0xff] %v3958_v15 }
 0x136   : > { %563 = vperm.xlu2 %3384, %v552_v35   ;;  %3383 = vset.pattern.permute.xlu1 %v3647_v1 }
 0x138   : > { %v3874_v36 = vpop.permute.xlu2 %446  ;;  %v3895_v59 = vpop.permute.xlu1 %377 }
 0x139   : > { %1286 = vrot.lane.b32.xlu0 %v3813_v40, %s3524_s21  ;;  %6176 = vst [vmem:[#allocation11_spill] sm:$0xff] %v3874_v36  ;;  %v1176_v36 = vrot.slane %v3766_v19, 4 }
 0x13e   : > { %576 = vperm.xlu2 %3384, %v565_v48   ;;  %557 = vperm.xlu1 %3383, %v552_v35   ;;  %v710_v35 = vrot.slane %v395_v23, 4 }
 0x140   : > { %v711_v25 = vsel %vm634_vm1, 0.0, %v710_v35  ;;  %v3932_v35 = vpop.permute.xlu1 %390 }
 0x141   : > { %1292 = vrot.lane.b32.xlu0 %v3831_v61, %s3524_s21  ;;  %v3890_v45 = vperm.slane %v711_v25, %v3750_v12  ;;  %v816_v25 = vrot.slane %v3926_v21, 4 }
 0x143   : > { %v3909_v5 = vperm.slane %v3890_v45, %v3758_v17 }
 0x146   : > { %3387 = vset.pattern.permute.xlu2 %v3647_v1  ;;  %570 = vperm.xlu1 %3383, %v565_v48   ;;  %v1101_v1 = vsel %vm634_vm1, 0.0, %v1100_v11  ;;  %v3892_v48 = vpop.permute.xlu0 %195  ;;  %v1166_v11 = vrot.slane %v3753_v14, 4  ;;  %v3938_v14 = vperm.slane %v3917_v7, %v3758_v17 }
 0x147   : > { %v3866_v29 = vperm.slane %v1101_v1, %v3758_v17 }
 0x148   : > { %v3904_v60 = vpop.permute.xlu2 %466 }
 0x149   : > { %1314 = vrot.lane.b32.xlu0 %v667_v9, %s3525_s26  ;;  %v1122_v44 = vrot.slane %v3866_v29, 4  ;;  %v3920_v9 = vperm.slane %v1095_v6, %v3758_v17 }
 0x14b   : > { %v1123_v38 = vsel %vm634_vm1, 0.0, %v1122_v44  ;;  %v1120_v44 = vrot.slane %v3920_v9, 4 }
 0x14e   : > { %596 = vperm.xlu2 %3387, %v591_v13   ;;  %3386 = vset.pattern.permute.xlu1 %v3653_v16  ;;  %v3879_v16 = vperm.slane %v3869_v31, %v3758_v17  ;;  %v3928_v1 = vpop.permute.xlu0 %273 }
 0x150   : > { %v740_v42 = vrot.slane %v3879_v16, 4  ;;  %v3941_v27 = vpop.permute.xlu2 %479 }
 0x151   : > { %1320 = vrot.lane.b32.xlu0 %v895_v28, %s3525_s26 }
 0x156   : > { %609 = vperm.xlu2 %3387, %v604_v56   ;;  %589 = vperm.xlu1 %3386, %v578_v30   ;;  %v3901_v30 = vperm.slane %v639_v39, %v3758_v17  ;;  %v741_v56 = vsel %vm634_vm1, 0.0, %v740_v42  ;;  %v892_v39 = vrot.slane %v3898_v26, 4  ;;  %v720_v42 = vrot.slane %v3869_v31, 4  ;;  %v3966_v31 = vpop.permute.xlu0 %338 }
 0x158   : > { %6178 = vst [vmem:[#allocation13_spill] sm:$0xff] %v3901_v30  ;;  %v664_v58 = vrot.slane %v3901_v30, 4  ;;  %v893_v23 = vsel %vm634_vm1, 0.0, %v892_v39  ;;  %v1121_v39 = vsel %vm634_vm1, 0.0, %v1120_v44 }
 0x159   : > { %1326 = vrot.lane.b32.xlu0 %v1123_v38, %s3525_s26 }
 0x15a   : > { %v665_v28 = vsel %vm634_vm1, 0.0, %v664_v58  ;;  %v817_v58 = vsel %vm634_vm1, 0.0, %v816_v25 }
 0x15e   : > { %1252 = vrot.lane.b32.xlu2 %v741_v56, %s3523_s17  ;;  %602 = vperm.xlu1 %3386, %v591_v13   ;;  %v786_v13 = vrot.slane %v3784_v24, 4  ;;  %v1167_v24 = vsel %vm634_vm1, 0.0, %v1166_v11  ;;  %v1014_v56 = vrot.slane %v3797_v33, 4  ;;  %v3962_v11 = vpop.permute.xlu1 %427 }
 0x15f   : > { %v3949_v38 = vperm.slane %v1167_v24, %v3750_v12  ;;  %v1044_v24 = vrot.slane %v3958_v15, 4 }
 0x160   : > { %v787_v6 = vsel %vm634_vm1, 0.0, %v786_v13  ;;  %v3972_v33 = vpop.permute.xlu2 %498 }
 0x161   : > { %1348 = vrot.lane.b32.xlu0 %v3909_v5, %s3526_s2  ;;  %v3953_v53 = vperm.slane %v787_v6, %v3750_v12  ;;  %v3970_v13 = vperm.slane %v3949_v38, %v3758_v17  ;;  %6181 = vst [vmem:[#allocation16_spill] sm:$0xff] %v3972_v33 }
 0x163   : > { %v3976_v37 = vperm.slane %v3953_v53, %v3758_v17 }
 0x165   : > { %v820_v25 = vrot.slane %v3976_v37, 4 }
 0x166   : > { %1256 = vrot.lane.b32.xlu2 %v893_v23, %s3523_s17  ;;  %1250 = vrot.lane.b32.xlu1 %v665_v28, %s3523_s17  ;;  %v1015_v23 = vsel %vm634_vm1, 0.0, %v1014_v56  ;;  %v721_v28 = vsel %vm634_vm1, 0.0, %v720_v42  ;;  %v1045_v56 = vsel %vm634_vm1, 0.0, %v1044_v24  ;;  %v3993_v42 = vpop.permute.xlu0 %420  ;;  %v3995_v49 = vpop.permute.xlu1 %440 }
 0x167   : > { %v3984_v6 = vperm.slane %v1015_v23, %v3750_v12  ;;  %v729_v44 = vperm.slane %v721_v28, %v3758_v17  ;;  %6182 = vst [vmem:[#allocation17_spill] sm:$0xff] %v3993_v42  ;;  %v821_v23 = vsel %vm634_vm1, 0.0, %v820_v25  ;;  %v862_v25 = vrot.slane %v3821_v46, 4 }
 0x168   : > { %v4005_v24 = vpop.permute.xlu2 %511  ;;  %v1177_v46 = vsel %vm634_vm1, 0.0, %v1176_v36 }
 0x169   : > { %1354 = vrot.lane.b32.xlu0 %v3938_v14, %s3526_s2  ;;  %v4000_v28 = vperm.slane %v3984_v6, %v3758_v17  ;;  %6183 = vst [vmem:[#allocation18_spill] sm:$0xff] %v4005_v24  ;;  %v1185_v26 = vperm.slane %v1177_v46, %v3758_v17 }
 0x16b   : > { %v1048_v42 = vrot.slane %v4000_v28, 4 }
 0x16e   : > { %1262 = vrot.lane.b32.xlu2 %v1121_v39, %s3523_s17  ;;  %1254 = vrot.lane.b32.xlu1 %v817_v58, %s3523_s17  ;;  %v633_v39 = vrot.slane %v3801_v34, 4  ;;  %v948_v58 = vrot.slane %v3762_v18, 4  ;;  %v4019_v24 = vpop.permute.xlu0 %485 }
 0x16f   : > { %6185 = vst [vmem:[#allocation20_spill] sm:$0xff] %v4019_v24 }
 0x170   : > { %v635_v34 = vsel %vm634_vm1, 0.0, %v633_v39  ;;  %v949_v18 = vsel %vm634_vm1, 0.0, %v948_v58  ;;  %v4015_v39 = vpop.permute.xlu1 %459  ;;  %v1049_v58 = vsel %vm634_vm1, 0.0, %v1048_v42 }
 0x171   : > { %1360 = vrot.lane.b32.xlu0 %v3970_v13, %s3526_s2  ;;  %v957_v33 = vperm.slane %v949_v18, %v3758_v17  ;;  %6184 = vst [vmem:[#allocation19_spill] sm:$0xff] %v4015_v39  ;;  %v1090_v39 = vrot.slane %v3842_v2, 4 }
 0x173   : > { %v1091_v36 = vsel %vm634_vm1, 0.0, %v1090_v39 }
 0x176   : > { %1284 = vrot.lane.b32.xlu2 %v729_v44, %s3524_s21  ;;  %1260 = vrot.lane.b32.xlu1 %v1045_v56, %s3523_s17  ;;  %v643_v56 = vperm.slane %v635_v34, %v3750_v12  ;;  %v863_v34 = vsel %vm634_vm1, 0.0, %v862_v25  ;;  %v4041_v2 = vpop.permute.xlu0 %550 }
 0x177   : > { %v871_v19 = vperm.slane %v863_v34, %v3750_v12  ;;  %6187 = vst [vmem:[#allocation22_spill] sm:$0xff] %v4041_v2  ;;  %v1099_v34 = vperm.slane %v1091_v36, %v3750_v12  ;;  %v742_v36 = vrot.slane %v729_v44, 4  ;;  %v958_v44 = vrot.slane %v3917_v7, 4 }
 0x178   : > { %v4024_v18 = vpop.permute.xlu2 %531 }
 0x179   : > { %1382 = vrot.lane.b32.xlu0 %v821_v23, %s3527_s3  ;;  %v654_v23 = vrot.slane %v643_v56, 4  ;;  %v882_v25 = vrot.slane %v871_v19, 4 }
 0x17e   : > { %1290 = vrot.lane.b32.xlu2 %v957_v33, %s3524_s21  ;;  %1282 = vrot.lane.b32.xlu1 %v3836_v50, %s3524_s21  ;;  %v655_v50 = vsel %vm634_vm1, 0.0, %v654_v23  ;;  %v4039_v23 = vpop.permute.xlu1 %472  ;;  %v4060_v24 = vpop.permute.xlu0 %615 }
 0x17f   : > { %v4033_v42 = vperm.slane %v655_v50, %v3758_v17  ;;  %6186 = vst [vmem:[#allocation21_spill] sm:$0xff] %v4039_v23  ;;  %v730_v23 = vrot.slane %v3890_v45, 4 }
 0x180   : > { %v4046_v50 = vpop.permute.xlu2 %544  ;;  %6188 = vst [vmem:[#allocation23_spill] sm:$0xff] %v4060_v24  ;;  %v1186_v24 = vrot.slane %v3949_v38, 4 }
 0x181   : > { %1388 = vrot.lane.b32.xlu0 %v1049_v58, %s3527_s3  ;;  %v818_v58 = vrot.slane %v3813_v40, 4  ;;  %v1110_v40 = vrot.slane %v1099_v34, 4  ;;  %v731_v2 = vsel %vm634_vm1, 0.0, %v730_v23 }
 0x182   : > { %v4074_v45 = vperm.slane %v731_v2, %v3758_v17 }
 0x183   : > { %v819_v46 = vsel %vm634_vm1, 0.0, %v818_v58 }
 0x186   : > { %1296 = vrot.lane.b32.xlu2 %v1185_v26, %s3524_s21  ;;  %1288 = vrot.lane.b32.xlu1 %v3853_v10, %s3524_s21  ;;  %v883_v10 = vsel %vm634_vm1, 0.0, %v882_v25  ;;  %v1046_v25 = vrot.slane %v3831_v61, 4  ;;  %v4058_v58 = vpop.permute.xlu1 %492 }
 0x187   : > { %v4052_v39 = vperm.slane %v883_v10, %v3758_v17 }
 0x188   : > { %v1047_v10 = vsel %vm634_vm1, 0.0, %v1046_v25  ;;  %v659_v25 = vperm.slane %v643_v56, %v3758_v17  ;;  %v1198_v56 = vrot.slane %v1185_v26, 4 }
 0x189   : > { %1410 = vrot.lane.b32.xlu0 %v4033_v42, %s3528_s4 }
 0x18e   : > { %1318 = vrot.lane.b32.xlu2 %v819_v46, %s3525_s26  ;;  %1294 = vrot.lane.b32.xlu1 %v3866_v29, %s3524_s21  ;;  %v1111_v46 = vsel %vm634_vm1, 0.0, %v1110_v40  ;;  %v743_v29 = vsel %vm634_vm1, 0.0, %v742_v36  ;;  %v970_v40 = vrot.slane %v957_v33, 4  ;;  %v4081_v23 = vpop.permute.xlu1 %505 }
 0x18f   : > { %v4071_v61 = vperm.slane %v1111_v46, %v3758_v17 }
 0x190   : > { %v4066_v30 = vpop.permute.xlu2 %563  ;;  %v971_v46 = vsel %vm634_vm1, 0.0, %v970_v40 }
 0x191   : > { %1416 = vrot.lane.b32.xlu0 %v4052_v39, %s3528_s4  ;;  %6189 = vst [vmem:[#allocation24_spill] sm:$0xff] %v4066_v30 }
 0x196   : > { %1316 = vrot.lane.b32.xlu1 %v743_v29, %s3525_s26  ;;  %1324 = vrot.lane.b32.xlu2 %v1047_v10, %s3525_s26  ;;  %v746_v29 = vrot.slane %v4074_v45, 4  ;;  %v959_v10 = vsel %vm634_vm1, 0.0, %v958_v44 }
 0x197   : > { %v4093_v2 = vperm.slane %v959_v10, %v3758_v17 }
 0x198   : > { %v4089_v7 = vpop.permute.xlu2 %576  ;;  %v747_v33 = vsel %vm634_vm1, 0.0, %v746_v29  ;;  %v4099_v44 = vpop.permute.xlu1 %524  ;;  %v1187_v29 = vsel %vm634_vm1, 0.0, %v1186_v24 }
 0x199   : > { %1422 = vrot.lane.b32.xlu0 %v4071_v61, %s3528_s4  ;;  %6190 = vst [vmem:[#allocation25_spill] sm:$0xff] %v4089_v7  ;;  %v974_v30 = vrot.slane %v4093_v2, 4  ;;  %v1199_v7 = vsel %vm634_vm1, 0.0, %v1198_v56  ;;  %v4111_v10 = vperm.slane %v1187_v29, %v3758_v17 }
 0x19a   : > { %6192 = vst [vmem:[#allocation27_spill] sm:$0xff] %v4099_v44 }
 0x19b   : > { %v4079_v36 = vpop.permute.xlu0 %1258  ;;  %v975_v26 = vsel %vm634_vm1, 0.0, %v974_v30  ;;  %v1202_v56 = vrot.slane %v4111_v10, 4  ;;  %v4126_v30 = vsel %vm392_vm0, %v3695_v41, %v3746_v4  ;;  %v4152_v4 = vsel %vm392_vm0, %v3726_v55, %v3743_v3 }
 0x19d   : > { %v1203_v29 = vsel %vm634_vm1, 0.0, %v1202_v56  ;;  %v4159_v56 = vsel %vm392_vm0, %v3892_v48, %v3724_v54 }
 0x19e   : > { %1322 = vrot.lane.b32.xlu1 %v971_v46, %s3525_s26  ;;  %1346 = vrot.lane.b32.xlu2 %v659_v25, %s3526_s2  ;;  %v887_v46 = vperm.slane %v871_v19, %v3758_v17  ;;  %v4172_v3 = vperm.slane %v4159_v56, %v3750_v12 }
 0x1a0   : > { %v4118_v24 = vpop.permute.xlu1 %537 }
 0x1a1   : > { %1444 = vrot.lane.b32.xlu0 %v747_v33, %s3529_s5  ;;  %v1115_v33 = vperm.slane %v1099_v34, %v3758_v17  ;;  %6194 = vst [vmem:[#allocation29_spill] sm:$0xff] %v4118_v24  ;;  %v744_v34 = vrot.slane %v3909_v5, 4 }
 0x1a3   : > { %v4097_v40 = vpop.permute.xlu0 %1264  ;;  %v745_v24 = vsel %vm634_vm1, 0.0, %v744_v34 }
 0x1a4   : > { %6191 = vst [vmem:[#allocation26_spill] sm:$0xff] %v4097_v40 }
 0x1a6   : > { %1328 = vrot.lane.b32.xlu1 %v1199_v7, %s3525_s26  ;;  %1352 = vrot.lane.b32.xlu2 %v887_v46, %s3526_s2 }
 0x1a8   : > { %v4107_v38 = vpop.permute.xlu2 %596 }
 0x1a9   : > { %1450 = vrot.lane.b32.xlu0 %v975_v26, %s3529_s5  ;;  %v4135_v26 = vperm.slane %v4126_v30, %v3750_v12 }
 0x1ab   : > { %v4114_v19 = vpop.permute.xlu0 %1286  ;;  %v4147_v41 = vperm.slane %v4135_v26, %v3758_v17 }
 0x1ac   : > { %6193 = vst [vmem:[#allocation28_spill] sm:$0xff] %v4114_v19 }
 0x1ae   : > { %1350 = vrot.lane.b32.xlu1 %v3976_v37, %s3526_s2  ;;  %1358 = vrot.lane.b32.xlu2 %v1115_v33, %s3526_s2 }
 0x1b0   : > { %v4128_v7 = vpop.permute.xlu2 %609  ;;  %v4140_v44 = vpop.permute.xlu1 %557 }
 0x1b1   : > { %1456 = vrot.lane.b32.xlu0 %v1203_v29, %s3529_s5  ;;  %v4166_v29 = vperm.slane %v4152_v4, %v3750_v12 }
 0x1b3   : > { %v4137_v37 = vpop.permute.xlu0 %1292 }
 0x1b4   : > { %6195 = vst [vmem:[#allocation30_spill] sm:$0xff] %v4137_v37 }
 0x1b6   : > { %1380 = vrot.lane.b32.xlu2 %v745_v24, %s3527_s3  ;;  %1356 = vrot.lane.b32.xlu1 %v4000_v28, %s3526_s2  ;;  %v972_v28 = vrot.slane %v3938_v14, 4  ;;  %v668_v24 = vrot.slane %v659_v25, 4  ;;  %v4180_v14 = vperm.slane %v4166_v29, %v3758_v17  ;;  %v4184_v25 = vperm.slane %v4172_v3, %v3758_v17 }
 0x1b8   : > { %v4154_v5 = vpop.permute.xlu2 %1252  ;;  %v973_v54 = vsel %vm634_vm1, 0.0, %v972_v28  ;;  %v669_v48 = vsel %vm634_vm1, 0.0, %v668_v24  ;;  %v4186_v34 = vpop.permute.xlu1 %570  ;;  %v4193_v28 = vsel %vm392_vm0, %v3701_v43, %v3966_v31  ;;  %v1200_v24 = vrot.slane %v3970_v13, 4 }
 0x1b9   : > { %1478 = vrot.lane.b32.xlu0 %v4147_v41, %s3530_s14  ;;  %v4202_v37 = vperm.slane %v4193_v28, %v3750_v12  ;;  %v702_v15 = vrot.slane %v4184_v25, 4  ;;  %v806_v43 = vrot.slane %v3953_v53, 4 }
 0x1bb   : > { %v4168_v55 = vpop.permute.xlu0 %1314  ;;  %v4212_v31 = vperm.slane %v4202_v37, %v3758_v17  ;;  %v807_v53 = vsel %vm634_vm1, 0.0, %v806_v43 }
 0x1bc   : > { %6196 = vst [vmem:[#allocation31_spill] sm:$0xff] %v4168_v55 }
 0x1be   : > { %1386 = vrot.lane.b32.xlu2 %v973_v54, %s3527_s3  ;;  %1378 = vrot.lane.b32.xlu1 %v669_v48, %s3527_s3  ;;  %v896_v54 = vrot.slane %v887_v46, 4 }
 0x1c0   : > { %v4188_v55 = vpop.permute.xlu2 %1256  ;;  %v897_v19 = vsel %vm634_vm1, 0.0, %v896_v54 }
 0x1c1   : > { %6197 = vst [vmem:[#allocation32_spill] sm:$0xff] %v4188_v55  ;;  %1484 = vrot.lane.b32.xlu0 %v4180_v14, %s3530_s14  ;;  %v1201_v55 = vsel %vm634_vm1, 0.0, %v1200_v24  ;;  %v4222_v24 = vsel %vm392_vm0, %v3928_v1, %v3895_v59  ;;  %v1034_v59 = vrot.slane %v3984_v6, 4 }
 0x1c2   : > { %v4230_v54 = vperm.slane %v4222_v24, %v3750_v12 }
 0x1c3   : > { %v4198_v48 = vpop.permute.xlu0 %1320  ;;  %v1035_v6 = vsel %vm634_vm1, 0.0, %v1034_v59 }
 0x1c4   : > { %6198 = vst [vmem:[#allocation33_spill] sm:$0xff] %v4198_v48  ;;  %v703_v48 = vsel %vm634_vm1, 0.0, %v702_v15  ;;  %v930_v15 = vrot.slane %v4212_v31, 4  ;;  %v4240_v1 = vperm.slane %v4230_v54, %v3758_v17  ;;  %v1043_v22 = vperm.slane %v1035_v6, %v3758_v17 }
 0x1c5   : > { %v670_v6 = vrot.slane %v4033_v42, 4 }
 0x1c6   : > { %1392 = vrot.lane.b32.xlu2 %v1201_v55, %s3527_s3  ;;  %1384 = vrot.lane.b32.xlu1 %v897_v19, %s3527_s3  ;;  %v1124_v19 = vrot.slane %v1115_v33, 4  ;;  %v931_v43 = vsel %vm634_vm1, 0.0, %v930_v15 }
 0x1c8   : > { %v4214_v13 = vpop.permute.xlu2 %1262  ;;  %v4216_v46 = vpop.permute.xlu1 %589  ;;  %v1125_v21 = vsel %vm634_vm1, 0.0, %v1124_v19 }
 0x1c9   : > { %6199 = vst [vmem:[#allocation34_spill] sm:$0xff] %v4216_v46  ;;  %1506 = vrot.lane.b32.xlu0 %v703_v48, %s3531_s15  ;;  %v815_v46 = vperm.slane %v807_v53, %v3758_v17  ;;  %v4250_v53 = vsel %vm392_vm0, %v3710_v47, %v3741_v0 }
 0x1ca   : > { %v753_v19 = vperm.slane %v4250_v53, %v3750_v12 }
 0x1cb   : > { %v4226_v55 = vpop.permute.xlu0 %1326 }
 0x1cc   : > { %v758_v47 = vrot.slane %v753_v19, 4 }
 0x1ce   : > { %1414 = vrot.lane.b32.xlu2 %v815_v46, %s3528_s4  ;;  %1390 = vrot.lane.b32.xlu1 %v1125_v21, %s3527_s3 }
 0x1d0   : > { %v4242_v33 = vpop.permute.xlu2 %1284  ;;  %v4244_v48 = vpop.permute.xlu1 %602 }
 0x1d1   : > { %6200 = vst [vmem:[#allocation35_spill] sm:$0xff] %v4244_v48  ;;  %1512 = vrot.lane.b32.xlu0 %v931_v43, %s3531_s15  ;;  %v1158_v48 = vrot.slane %v4240_v1, 4  ;;  %v4271_v43 = vsel %vm392_vm0, %v3720_v52, %v3739_v63 }
 0x1d3   : > { %v4254_v21 = vpop.permute.xlu0 %1348  ;;  %v1159_v59 = vsel %vm634_vm1, 0.0, %v1158_v48 }
 0x1d6   : > { %1412 = vrot.lane.b32.xlu1 %v4074_v45, %s3528_s4  ;;  %1420 = vrot.lane.b32.xlu2 %v1043_v22, %s3528_s4  ;;  %v981_v45 = vperm.slane %v4271_v43, %v3750_v12 }
 0x1d8   : > { %v4263_v0 = vpop.permute.xlu2 %1290  ;;  %v4265_v15 = vpop.permute.xlu1 %1250  ;;  %v986_v63 = vrot.slane %v981_v45, 4 }
 0x1d9   : > { %6201 = vst [vmem:[#allocation36_spill] sm:$0xff] %v4263_v0  ;;  %1518 = vrot.lane.b32.xlu0 %v1159_v59, %s3531_s15  ;;  %v759_v0 = vsel %vm634_vm1, 0.0, %v758_v47  ;;  %v4294_v59 = vsel %vm392_vm0, %v3717_v51, %v3932_v35 }
 0x1da   : > { %6202 = vst [vmem:[#allocation37_spill] sm:$0xff] %v4265_v15  ;;  %v671_v15 = vsel %vm634_vm1, 0.0, %v670_v6  ;;  %v4285_v52 = vperm.slane %v759_v0, %v3758_v17  ;;  %v1209_v0 = vperm.slane %v4294_v59, %v3750_v12 }
 0x1db   : > { %v4275_v40 = vpop.permute.xlu0 %1354 }
 0x1dc   : > { %6203 = vst [vmem:[#allocation38_spill] sm:$0xff] %v4275_v40  ;;  %v1214_v35 = vrot.slane %v1209_v0, 4 }
 0x1de   : > { %1418 = vrot.lane.b32.xlu1 %v4093_v2, %s3528_s4  ;;  %1442 = vrot.lane.b32.xlu2 %v671_v15, %s3529_s5  ;;  %v898_v2 = vrot.slane %v4052_v39, 4  ;;  %v987_v15 = vsel %vm634_vm1, 0.0, %v986_v63  ;;  %v822_v63 = vrot.slane %v815_v46, 4 }
 0x1df   : > { %v4309_v51 = vperm.slane %v987_v15, %v3758_v17 }
 0x1e0   : > { %v4287_v48 = vpop.permute.xlu2 %1296  ;;  %v4289_v42 = vpop.permute.xlu1 %1254  ;;  %v899_v6 = vsel %vm634_vm1, 0.0, %v898_v2  ;;  %v1126_v2 = vrot.slane %v4071_v61, 4  ;;  %v823_v15 = vsel %vm634_vm1, 0.0, %v822_v63 }
 0x1e1   : > { %6204 = vst [vmem:[#allocation39_spill] sm:$0xff] %v4287_v48  ;;  %1540 = vrot.lane.b32.xlu0 %v4285_v52, %s3532_s19 }
 0x1e2   : > { %6205 = vst [vmem:[#allocation40_spill] sm:$0xff] %v4289_v42 }
 0x1e3   : > { %v4299_v47 = vpop.permute.xlu0 %1360 }
 0x1e4   : > { %6206 = vst [vmem:[#allocation41_spill] sm:$0xff] %v4299_v47  ;;  %v834_v47 = vrot.slane %v4135_v26, 4 }
 0x1e6   : > { %1424 = vrot.lane.b32.xlu1 %v4111_v10, %s3528_s4  ;;  %1448 = vrot.lane.b32.xlu2 %v899_v6, %s3529_s5  ;;  %v1215_v10 = vsel %vm634_vm1, 0.0, %v1214_v35  ;;  %v1127_v6 = vsel %vm634_vm1, 0.0, %v1126_v2  ;;  %v1062_v35 = vrot.slane %v4166_v29, 4  ;;  %v763_v2 = vperm.slane %v753_v19, %v3758_v17 }
 0x1e7   : > { %v4328_v26 = vperm.slane %v1215_v10, %v3758_v17 }
 0x1e8   : > { %v4311_v42 = vpop.permute.xlu2 %1318  ;;  %v4313_v39 = vpop.permute.xlu1 %1260 }
 0x1e9   : > { %6207 = vst [vmem:[#allocation42_spill] sm:$0xff] %v4311_v42  ;;  %1546 = vrot.lane.b32.xlu0 %v4309_v51, %s3532_s19  ;;  %v835_v42 = vsel %vm634_vm1, 0.0, %v834_v47  ;;  %v1050_v47 = vrot.slane %v1043_v22, 4 }
 0x1ea   : > { %6208 = vst [vmem:[#allocation43_spill] sm:$0xff] %v4313_v39  ;;  %v976_v39 = vrot.slane %v4271_v43, 4 }
 0x1eb   : > { %v4319_v40 = vpop.permute.xlu0 %1382 }
 0x1ec   : > { %6209 = vst [vmem:[#allocation44_spill] sm:$0xff] %v4319_v40  ;;  %v4335_v40 = vperm.slane %v835_v42, %v3758_v17 }
 0x1ee   : > { %1446 = vrot.lane.b32.xlu1 %v823_v15, %s3529_s5  ;;  %1454 = vrot.lane.b32.xlu2 %v1127_v6, %s3529_s5  ;;  %v856_v10 = vrot.slane %v4335_v40, 4  ;;  %v1051_v15 = vsel %vm634_vm1, 0.0, %v1050_v47  ;;  %v1063_v6 = vsel %vm634_vm1, 0.0, %v1062_v35  ;;  %v672_v35 = vrot.slane %v4159_v56, 4 }
 0x1ef   : > { %v991_v47 = vperm.slane %v981_v45, %v3758_v17 }
 0x1f0   : > { %v4330_v46 = vpop.permute.xlu2 %1324  ;;  %v4332_v61 = vpop.permute.xlu1 %1282  ;;  %v857_v22 = vsel %vm634_vm1, 0.0, %v856_v10  ;;  %v673_v10 = vsel %vm634_vm1, 0.0, %v672_v35 }
 0x1f1   : > { %6210 = vst [vmem:[#allocation45_spill] sm:$0xff] %v4330_v46  ;;  %1552 = vrot.lane.b32.xlu0 %v4328_v26, %s3532_s19  ;;  %v4373_v56 = vperm.slane %v673_v10, %v3750_v12 }
 0x1f2   : > { %6211 = vst [vmem:[#allocation46_spill] sm:$0xff] %v4332_v61 }
 0x1f3   : > { %v4340_v63 = vpop.permute.xlu0 %1388 }
 0x1f4   : > { %6212 = vst [vmem:[#allocation47_spill] sm:$0xff] %v4340_v63  ;;  %v4354_v63 = vperm.slane %v1063_v6, %v3758_v17 }
 0x1f6   : > { %1476 = vrot.lane.b32.xlu2 %v763_v2, %s3530_s14  ;;  %1452 = vrot.lane.b32.xlu1 %v1051_v15, %s3529_s5  ;;  %v1084_v15 = vrot.slane %v4354_v63, 4 }
 0x1f8   : > { %v4348_v42 = vpop.permute.xlu2 %1346  ;;  %v4350_v29 = vpop.permute.xlu1 %1288 }
 0x1f9   : > { %6213 = vst [vmem:[#allocation48_spill] sm:$0xff] %v4348_v42  ;;  %1574 = vrot.lane.b32.xlu0 %v857_v22, %s3533_s23  ;;  %v1085_v22 = vsel %vm634_vm1, 0.0, %v1084_v15  ;;  %v4379_v42 = vperm.slane %v1209_v0, %v3758_v17 }
 0x1fa   : > { %6214 = vst [vmem:[#allocation49_spill] sm:$0xff] %v4350_v29 }
 0x1fb   : > { %v4357_v19 = vpop.permute.xlu0 %1410 }
 0x1fc   : > { %6215 = vst [vmem:[#allocation50_spill] sm:$0xff] %v4357_v19  ;;  %v900_v19 = vrot.slane %v4193_v28, 4  ;;  %v854_v28 = vrot.slane %v4147_v41, 4 }
 0x1fe   : > { %1482 = vrot.lane.b32.xlu2 %v991_v47, %s3530_s14  ;;  %1474 = vrot.lane.b32.xlu1 %v4184_v25, %s3530_s14  ;;  %v4387_v25 = vperm.slane %v4373_v56, %v3758_v17  ;;  %v901_v35 = vsel %vm634_vm1, 0.0, %v900_v19  ;;  %v855_v19 = vsel %vm634_vm1, 0.0, %v854_v28 }
 0x200   : > { %v4366_v6 = vpop.permute.xlu2 %1352  ;;  %v4368_v29 = vpop.permute.xlu1 %1294 }
 0x201   : > { %6216 = vst [vmem:[#allocation51_spill] sm:$0xff] %v4366_v6  ;;  %1580 = vrot.lane.b32.xlu0 %v1085_v22, %s3533_s23  ;;  %v1128_v22 = vrot.slane %v4222_v24, 4 }
 0x203   : > { %v4375_v45 = vpop.permute.xlu0 %1416  ;;  %v1129_v41 = vsel %vm634_vm1, 0.0, %v1128_v22  ;;  %v682_v22 = vrot.slane %v4172_v3, 4 }
 0x204   : > { %6217 = vst [vmem:[#allocation52_spill] sm:$0xff] %v4375_v45  ;;  %v748_v45 = vrot.slane %v4250_v53, 4  ;;  %v778_v53 = vrot.slane %v763_v2, 4  ;;  %v4422_v28 = vperm.slane %v1129_v41, %v3750_v12 }
 0x205   : > { %v683_v43 = vsel %vm634_vm1, 0.0, %v682_v22  ;;  %v1204_v22 = vrot.slane %v4294_v59, 4 }
 0x206   : > { %1480 = vrot.lane.b32.xlu1 %v4212_v31, %s3530_s14  ;;  %1488 = vrot.lane.b32.xlu2 %v4379_v42, %s3530_s14  ;;  %v4398_v31 = vperm.slane %v901_v35, %v3750_v12  ;;  %v749_v24 = vsel %vm634_vm1, 0.0, %v748_v45  ;;  %v779_v45 = vsel %vm634_vm1, 0.0, %v778_v53 }
 0x207   : > { %v4427_v46 = vperm.slane %v749_v24, %v3750_v12  ;;  %v977_v24 = vsel %vm634_vm1, 0.0, %v976_v39  ;;  %v1205_v59 = vsel %vm634_vm1, 0.0, %v1204_v22 }
 0x208   : > { %v4390_v15 = vpop.permute.xlu2 %1358  ;;  %v4392_v10 = vpop.permute.xlu1 %1316  ;;  %v4410_v6 = vperm.slane %v4398_v31, %v3758_v17 }
 0x209   : > { %1602 = vrot.lane.b32.xlu0 %v4387_v25, %s3534_s18  ;;  %v4445_v3 = vperm.slane %v4427_v46, %v3758_v17 }
 0x20b   : > { %v4400_v0 = vpop.permute.xlu0 %1422 }
 0x20e   : > { %1486 = vrot.lane.b32.xlu1 %v4240_v1, %s3530_s14  ;;  %1510 = vrot.lane.b32.xlu2 %v855_v19, %s3531_s15  ;;  %v1082_v1 = vrot.slane %v4180_v14, 4  ;;  %v4437_v14 = vperm.slane %v4422_v28, %v3758_v17 }
 0x210   : > { %v4413_v35 = vpop.permute.xlu2 %1380  ;;  %v4415_v61 = vpop.permute.xlu1 %1322  ;;  %v1083_v48 = vsel %vm634_vm1, 0.0, %v1082_v1  ;;  %v4454_v1 = vperm.slane %v977_v24, %v3750_v12 }
 0x211   : > { %6218 = vst [vmem:[#allocation53_spill] sm:$0xff] %v4415_v61  ;;  %1608 = vrot.lane.b32.xlu0 %v4410_v6, %s3534_s18 }
 0x213   : > { %v4424_v19 = vpop.permute.xlu0 %1444 }
 0x214   : > { %6219 = vst [vmem:[#allocation54_spill] sm:$0xff] %v4424_v19  ;;  %v824_v19 = vrot.slane %v4126_v30, 4 }
 0x216   : > { %1508 = vrot.lane.b32.xlu1 %v779_v45, %s3531_s15  ;;  %1516 = vrot.lane.b32.xlu2 %v1083_v48, %s3531_s15  ;;  %v1006_v48 = vrot.slane %v991_v47, 4  ;;  %v4457_v45 = vperm.slane %v683_v43, %v3758_v17  ;;  %v825_v30 = vsel %vm634_vm1, 0.0, %v824_v19 }
 0x218   : > { %v4439_v2 = vpop.permute.xlu2 %1386  ;;  %v4441_v41 = vpop.permute.xlu1 %1328  ;;  %v1007_v39 = vsel %vm634_vm1, 0.0, %v1006_v48  ;;  %v1234_v48 = vrot.slane %v4379_v42, 4 }
 0x219   : > { %6220 = vst [vmem:[#allocation55_spill] sm:$0xff] %v4439_v2  ;;  %1614 = vrot.lane.b32.xlu0 %v4437_v14, %s3534_s18  ;;  %v910_v2 = vrot.slane %v4202_v37, 4 }
 0x21a   : > { %6221 = vst [vmem:[#allocation56_spill] sm:$0xff] %v4441_v41  ;;  %v782_v41 = vrot.slane %v4445_v3, 4  ;;  %v1235_v22 = vsel %vm634_vm1, 0.0, %v1234_v48 }
 0x21b   : > { %v4451_v53 = vpop.permute.xlu0 %1450  ;;  %v911_v37 = vsel %vm634_vm1, 0.0, %v910_v2  ;;  %v1138_v2 = vrot.slane %v4230_v54, 4 }
 0x21c   : > { %6222 = vst [vmem:[#allocation57_spill] sm:$0xff] %v4451_v53  ;;  %v783_v43 = vsel %vm634_vm1, 0.0, %v782_v41  ;;  %v4473_v53 = vperm.slane %v4454_v1, %v3758_v17  ;;  %v919_v41 = vperm.slane %v911_v37, %v3758_v17 }
 0x21d   : > { %v1139_v54 = vsel %vm634_vm1, 0.0, %v1138_v2 }
 0x21e   : > { %1514 = vrot.lane.b32.xlu1 %v1007_v39, %s3531_s15  ;;  %1538 = vrot.lane.b32.xlu2 %v4457_v45, %s3532_s19 }
 0x220   : > { %v4466_v47 = vpop.permute.xlu2 %1392  ;;  %v4468_v24 = vpop.permute.xlu1 %1350 }
 0x221   : > { %6223 = vst [vmem:[#allocation58_spill] sm:$0xff] %v4466_v47  ;;  %1636 = vrot.lane.b32.xlu0 %v783_v43, %s3535_s24  ;;  %v4482_v47 = vperm.slane %v1205_v59, %v3750_v12 }
 0x222   : > { %6224 = vst [vmem:[#allocation59_spill] sm:$0xff] %v4468_v24  ;;  %v1010_v24 = vrot.slane %v4473_v53, 4 }
 0x223   : > { %v4479_v39 = vpop.permute.xlu0 %1456  ;;  %v4498_v37 = vperm.slane %v4482_v47, %v3758_v17 }
 0x224   : > { %6225 = vst [vmem:[#allocation60_spill] sm:$0xff] %v4479_v39  ;;  %v1011_v59 = vsel %vm634_vm1, 0.0, %v1010_v24  ;;  %v1052_v24 = vrot.slane %v4152_v4, 4 }
 0x226   : > { %1544 = vrot.lane.b32.xlu2 %v919_v41, %s3532_s19  ;;  %1520 = vrot.lane.b32.xlu1 %v1235_v22, %s3531_s15  ;;  %v833_v22 = vperm.slane %v825_v30, %v3750_v12  ;;  %v1053_v30 = vsel %vm634_vm1, 0.0, %v1052_v24 }
 0x227   : > { %v1061_v4 = vperm.slane %v1053_v30, %v3750_v12  ;;  %v704_v30 = vrot.slane %v4457_v45, 4 }
 0x228   : > { %v4491_v42 = vpop.permute.xlu2 %1414  ;;  %v4493_v43 = vpop.permute.xlu1 %1356 }
 0x229   : > { %6226 = vst [vmem:[#allocation61_spill] sm:$0xff] %v4491_v42  ;;  %1642 = vrot.lane.b32.xlu0 %v1011_v59, %s3535_s24  ;;  %v1147_v42 = vperm.slane %v1139_v54, %v3758_v17  ;;  %v780_v54 = vrot.slane %v4285_v52, 4  ;;  %v1072_v24 = vrot.slane %v1061_v4, 4 }
 0x22a   : > { %6227 = vst [vmem:[#allocation62_spill] sm:$0xff] %v4493_v43  ;;  %v1238_v43 = vrot.slane %v4498_v37, 4 }
 0x22b   : > { %v4503_v48 = vpop.permute.xlu0 %1478 }
 0x22c   : > { %6228 = vst [vmem:[#allocation63_spill] sm:$0xff] %v4503_v48  ;;  %v1239_v59 = vsel %vm634_vm1, 0.0, %v1238_v43  ;;  %v844_v48 = vrot.slane %v833_v22, 4 }
 0x22e   : > { %1550 = vrot.lane.b32.xlu2 %v1147_v42, %s3532_s19  ;;  %1542 = vrot.lane.b32.xlu1 %v4335_v40, %s3532_s19  ;;  %v845_v61 = vsel %vm634_vm1, 0.0, %v844_v48  ;;  %v781_v40 = vsel %vm634_vm1, 0.0, %v780_v54  ;;  %v1008_v48 = vrot.slane %v4309_v51, 4 }
 0x22f   : > { %v4529_v43 = vperm.slane %v845_v61, %v3758_v17  ;;  %v1073_v61 = vsel %vm634_vm1, 0.0, %v1072_v24  ;;  %v920_v24 = vrot.slane %v4398_v31, 4 }
 0x230   : > { %v4512_v19 = vpop.permute.xlu2 %1420  ;;  %v4514_v2 = vpop.permute.xlu1 %1378 }
 0x231   : > { %6229 = vst [vmem:[#allocation64_spill] sm:$0xff] %v4512_v19  ;;  %1648 = vrot.lane.b32.xlu0 %v1239_v59, %s3535_s24 }
 0x232   : > { %6230 = vst [vmem:[#allocation65_spill] sm:$0xff] %v4514_v2 }
 0x233   : > { %v4520_v39 = vpop.permute.xlu0 %1484 }
 0x234   : > { %6231 = vst [vmem:[#allocation66_spill] sm:$0xff] %v4520_v39  ;;  %v692_v39 = vrot.slane %v4373_v56, 4  ;;  %v4549_v56 = vperm.slane %v1073_v61, %v3758_v17 }
 0x236   : > { %1572 = vrot.lane.b32.xlu2 %v781_v40, %s3533_s23  ;;  %1548 = vrot.lane.b32.xlu1 %v4354_v63, %s3532_s19  ;;  %v1009_v63 = vsel %vm634_vm1, 0.0, %v1008_v48  ;;  %v705_v40 = vsel %vm634_vm1, 0.0, %v704_v30  ;;  %v1236_v48 = vrot.slane %v4328_v26, 4 }
 0x238   : > { %v4531_v59 = vpop.permute.xlu2 %1442  ;;  %v4533_v52 = vpop.permute.xlu1 %1384 }
 0x239   : > { %6232 = vst [vmem:[#allocation67_spill] sm:$0xff] %v4531_v59  ;;  %1670 = vrot.lane.b32.xlu0 %v4529_v43, %s3536_s29 }
 0x23a   : > { %6233 = vst [vmem:[#allocation68_spill] sm:$0xff] %v4533_v52  ;;  %v693_v52 = vsel %vm634_vm1, 0.0, %v692_v39  ;;  %v932_v39 = vrot.slane %v919_v41, 4 }
 0x23b   : > { %v4540_v54 = vpop.permute.xlu0 %1506 }
 0x23c   : > { %6234 = vst [vmem:[#allocation69_spill] sm:$0xff] %v4540_v54  ;;  %v4556_v54 = vperm.slane %v693_v52, %v3758_v17 }
 0x23e   : > { %1578 = vrot.lane.b32.xlu2 %v1009_v63, %s3533_s23  ;;  %1570 = vrot.lane.b32.xlu1 %v705_v40, %s3533_s23  ;;  %v708_v61 = vrot.slane %v4556_v54, 4  ;;  %v933_v63 = vsel %vm634_vm1, 0.0, %v932_v39  ;;  %v1237_v40 = vsel %vm634_vm1, 0.0, %v1236_v48  ;;  %v1160_v39 = vrot.slane %v1147_v42, 4 }
 0x23f   : > { %v849_v48 = vperm.slane %v833_v22, %v3758_v17  ;;  %v4599_v22 = vsel %vm392_vm0, %v3962_v11, %v4024_v18 }
 0x240   : > { %v4551_v51 = vpop.permute.xlu2 %1448  ;;  %v4553_v45 = vpop.permute.xlu1 %1390  ;;  %v709_v26 = vsel %vm634_vm1, 0.0, %v708_v61 }
 0x241   : > { %6235 = vst [vmem:[#allocation70_spill] sm:$0xff] %v4551_v51  ;;  %1676 = vrot.lane.b32.xlu0 %v4549_v56, %s3536_s29  ;;  %v921_v51 = vsel %vm634_vm1, 0.0, %v920_v24 }
 0x242   : > { %v4576_v41 = vperm.slane %v921_v51, %v3758_v17 }
 0x243   : > { %v4562_v30 = vpop.permute.xlu0 %1512 }
 0x244   : > { %6236 = vst [vmem:[#allocation71_spill] sm:$0xff] %v4562_v30  ;;  %v1148_v30 = vrot.slane %v4422_v28, 4 }
 0x246   : > { %1576 = vrot.lane.b32.xlu1 %v933_v63, %s3533_s23  ;;  %1584 = vrot.lane.b32.xlu2 %v1237_v40, %s3533_s23  ;;  %v936_v63 = vrot.slane %v4576_v41, 4  ;;  %v1161_v40 = vsel %vm634_vm1, 0.0, %v1160_v39  ;;  %v1149_v59 = vsel %vm634_vm1, 0.0, %v1148_v30  ;;  %v1077_v39 = vperm.slane %v1061_v4, %v3758_v17 }
 0x247   : > { %v4594_v61 = vperm.slane %v1149_v59, %v3758_v17  ;;  %v4625_v4 = vsel %vm392_vm0, %v3904_v60, %v4186_v34 }
 0x248   : > { %v4570_v31 = vpop.permute.xlu2 %1454  ;;  %v4572_v52 = vpop.permute.xlu1 %1412  ;;  %v937_v42 = vsel %vm634_vm1, 0.0, %v936_v63  ;;  %v4633_v2 = vperm.slane %v4625_v4, %v3750_v12 }
 0x249   : > { %1698 = vrot.lane.b32.xlu0 %v709_v26, %s3537_s20  ;;  %v4606_v26 = vperm.slane %v4599_v22, %v3750_v12  ;;  %v1164_v63 = vrot.slane %v4594_v61, 4 }
 0x24a   : > { %v4642_v60 = vperm.slane %v4633_v2, %v3758_v17 }
 0x24b   : > { %v4580_v24 = vpop.permute.xlu0 %1518  ;;  %v4615_v11 = vperm.slane %v4606_v26, %v3758_v17 }
 0x24c   : > { %6240 = vst [vmem:[#allocation75_spill] sm:$0xff] %v4642_v60 }
 0x24d   : > { %6237 = vst [vmem:[#allocation72_spill] sm:$0xff] %v4615_v11  ;;  %v1963_v19 = vrot.slane %v4615_v11, 4  ;;  %v2191_v11 = vrot.slane %v4642_v60, 4 }
 0x24e   : > { %1582 = vrot.lane.b32.xlu1 %v1161_v40, %s3533_s23  ;;  %1606 = vrot.lane.b32.xlu2 %v849_v48, %s3534_s18  ;;  %v1165_v40 = vsel %vm634_vm1, 0.0, %v1164_v63 }
 0x24f   : > { %v1964_v63 = vsel %vm634_vm1, 0.0, %v1963_v19  ;;  %v2192_v19 = vsel %vm634_vm1, 0.0, %v2191_v11  ;;  %v768_v11 = vrot.slane %v4427_v46, 4  ;;  %v4704_v46 = vsel %vm392_vm0, %v3941_v27, %v3871_v32 }
 0x250   : > { %v4588_v51 = vpop.permute.xlu2 %1476  ;;  %v4590_v28 = vpop.permute.xlu1 %1418  ;;  %v996_v27 = vrot.slane %v4454_v1, 4 }
 0x251   : > { %1704 = vrot.lane.b32.xlu0 %v937_v42, %s3537_s20 }
 0x253   : > { %v4602_v30 = vpop.permute.xlu0 %1540 }
 0x256   : > { %1604 = vrot.lane.b32.xlu1 %v4445_v3, %s3534_s18  ;;  %1612 = vrot.lane.b32.xlu2 %v1077_v39, %s3534_s18  ;;  %v706_v3 = vrot.slane %v4387_v25, 4 }
 0x258   : > { %v4617_v18 = vpop.permute.xlu2 %1482  ;;  %v4619_v59 = vpop.permute.xlu1 %1424 }
 0x259   : > { %6238 = vst [vmem:[#allocation73_spill] sm:$0xff] %v4619_v59  ;;  %1710 = vrot.lane.b32.xlu0 %v1165_v40, %s3537_s20  ;;  %v707_v59 = vsel %vm634_vm1, 0.0, %v706_v3  ;;  %v4652_v40 = vsel %vm392_vm0, %v4081_v23, %v4128_v7 }
 0x25a   : > { %v4660_v3 = vperm.slane %v4652_v40, %v3750_v12 }
 0x25b   : > { %v4629_v42 = vpop.permute.xlu0 %1546 }
 0x25c   : > { %6239 = vst [vmem:[#allocation74_spill] sm:$0xff] %v4629_v42  ;;  %v4669_v23 = vperm.slane %v4660_v3, %v3758_v17 }
 0x25e   : > { %1610 = vrot.lane.b32.xlu1 %v4473_v53, %s3534_s18  ;;  %1634 = vrot.lane.b32.xlu2 %v707_v59, %s3535_s24  ;;  %v934_v53 = vrot.slane %v4410_v6, 4  ;;  %6244 = vst [vmem:[#allocation79_spill] sm:$0xff] %v4669_v23 }
 0x260   : > { %v4644_v34 = vpop.permute.xlu2 %1488  ;;  %v4646_v25 = vpop.permute.xlu1 %1446 }
 0x261   : > { %6241 = vst [vmem:[#allocation76_spill] sm:$0xff] %v4644_v34  ;;  %2475 = vrot.lane.b32.xlu0 %v1964_v63, %s3523_s17  ;;  %v4679_v63 = vsel %vm392_vm0, %v3995_v49, %v4046_v50 }
 0x262   : > { %6242 = vst [vmem:[#allocation77_spill] sm:$0xff] %v4646_v25  ;;  %v935_v25 = vsel %vm634_vm1, 0.0, %v934_v53  ;;  %v4687_v60 = vperm.slane %v4679_v63, %v3750_v12 }
 0x263   : > { %v4656_v59 = vpop.permute.xlu0 %1552 }
 0x264   : > { %6243 = vst [vmem:[#allocation78_spill] sm:$0xff] %v4656_v59  ;;  %v2019_v50 = vrot.slane %v4687_v60, 4 }
 0x266   : > { %1640 = vrot.lane.b32.xlu2 %v935_v25, %s3535_s24  ;;  %1616 = vrot.lane.b32.xlu1 %v4498_v37, %s3534_s18  ;;  %v1162_v25 = vrot.slane %v4437_v14, 4  ;;  %v858_v37 = vrot.slane %v849_v48, 4 }
 0x268   : > { %v4671_v7 = vpop.permute.xlu2 %1510  ;;  %v4673_v6 = vpop.permute.xlu1 %1452  ;;  %v859_v49 = vsel %vm634_vm1, 0.0, %v858_v37  ;;  %v4711_v37 = vsel %vm392_vm0, %v3833_v62, %v3849_v8 }
 0x269   : > { %6245 = vst [vmem:[#allocation80_spill] sm:$0xff] %v4671_v7  ;;  %2481 = vrot.lane.b32.xlu0 %v2192_v19, %s3523_s17  ;;  %v1163_v7 = vsel %vm634_vm1, 0.0, %v1162_v25  ;;  %v769_v25 = vsel %vm634_vm1, 0.0, %v768_v11 }
 0x26a   : > { %6246 = vst [vmem:[#allocation81_spill] sm:$0xff] %v4673_v6  ;;  %v2419_v6 = vrot.slane %v4669_v23, 4  ;;  %v2020_v23 = vsel %vm634_vm1, 0.0, %v2019_v50  ;;  %v4721_v32 = vperm.slane %v769_v25, %v3758_v17  ;;  %v997_v25 = vsel %vm634_vm1, 0.0, %v996_v27 }
 0x26b   : > { %v4683_v53 = vpop.permute.xlu0 %1574  ;;  %v4731_v62 = vperm.slane %v2020_v23, %v3758_v17 }
 0x26c   : > { %6247 = vst [vmem:[#allocation82_spill] sm:$0xff] %v4683_v53  ;;  %v2420_v19 = vsel %vm634_vm1, 0.0, %v2419_v6  ;;  %v4717_v6 = vperm.slane %v4704_v46, %v3750_v12 }
 0x26e   : > { %1646 = vrot.lane.b32.xlu2 %v1163_v7, %s3535_s24  ;;  %1638 = vrot.lane.b32.xlu1 %v859_v49, %s3535_s24  ;;  %v1086_v7 = vrot.slane %v1077_v39, 4  ;;  %v1862_v39 = vperm.slane %v4711_v37, %v3750_v12  ;;  %v2247_v8 = vrot.slane %v4717_v6, 4 }
 0x270   : > { %v4696_v14 = vpop.permute.xlu2 %1516  ;;  %v4698_v48 = vpop.permute.xlu1 %1474  ;;  %v1087_v11 = vsel %vm634_vm1, 0.0, %v1086_v7  ;;  %v1867_v1 = vrot.slane %v1862_v39, 4  ;;  %v4744_v7 = vsel %vm392_vm0, %v3825_v57, %v4140_v44  ;;  %v2248_v23 = vsel %vm634_vm1, 0.0, %v2247_v8 }
 0x271   : > { %6248 = vst [vmem:[#allocation83_spill] sm:$0xff] %v4696_v14  ;;  %2487 = vrot.lane.b32.xlu0 %v2420_v19, %s3523_s17  ;;  %v4758_v57 = vperm.slane %v2248_v23, %v3758_v17  ;;  %v860_v14 = vrot.slane %v4529_v43, 4  ;;  %v4819_v34 = vperm.slane %v1862_v39, %v3758_v17 }
 0x272   : > { %6249 = vst [vmem:[#allocation84_spill] sm:$0xff] %v4698_v48  ;;  %v2090_v48 = vperm.slane %v4744_v7, %v3750_v12 }
 0x273   : > { %v4713_v49 = vpop.permute.xlu0 %1580  ;;  %v861_v59 = vsel %vm634_vm1, 0.0, %v860_v14  ;;  %v784_v14 = vrot.slane %v4721_v32, 4  ;;  %6257 = vst [vmem:[#allocation92_spill] sm:$0xff] %v4819_v34  ;;  %v1887_v39 = vrot.slane %v4819_v34, 4  ;;  %v4868_v34 = vperm.slane %v4687_v60, %v3758_v17 }
 0x274   : > { %6250 = vst [vmem:[#allocation85_spill] sm:$0xff] %v4713_v49  ;;  %v1005_v49 = vperm.slane %v997_v25, %v3758_v17 }
 0x275   : > { %6261 = vst [vmem:[#allocation96_spill] sm:$0xff] %v4868_v34 }
 0x276   : > { %1668 = vrot.lane.b32.xlu2 %v4721_v32, %s3536_s29  ;;  %1644 = vrot.lane.b32.xlu1 %v1087_v11, %s3535_s24 }
 0x278   : > { %v4734_v50 = vpop.permute.xlu2 %1538  ;;  %v4736_v19 = vpop.permute.xlu1 %1480 }
 0x279   : > { %6251 = vst [vmem:[#allocation86_spill] sm:$0xff] %v4734_v50  ;;  %2509 = vrot.lane.b32.xlu0 %v4731_v62, %s3524_s21  ;;  %v1868_v50 = vsel %vm634_vm1, 0.0, %v1867_v1  ;;  %v2095_v1 = vrot.slane %v2090_v48, 4 }
 0x27a   : > { %6252 = vst [vmem:[#allocation87_spill] sm:$0xff] %v4736_v19  ;;  %v1224_v19 = vrot.slane %v4482_v47, 4  ;;  %v4765_v8 = vperm.slane %v1868_v50, %v3758_v17 }
 0x27b   : > { %v4746_v11 = vpop.permute.xlu0 %1602 }
 0x27c   : > { %6253 = vst [vmem:[#allocation88_spill] sm:$0xff] %v4746_v11  ;;  %v1225_v47 = vsel %vm634_vm1, 0.0, %v1224_v19  ;;  %v2096_v11 = vsel %vm634_vm1, 0.0, %v2095_v1 }
 0x27d   : > { %v1233_v23 = vperm.slane %v1225_v47, %v3758_v17  ;;  %v4791_v47 = vperm.slane %v2096_v11, %v3758_v17 }
 0x27e   : > { %1674 = vrot.lane.b32.xlu2 %v1005_v49, %s3536_s29  ;;  %1666 = vrot.lane.b32.xlu1 %v4556_v54, %s3536_s29  ;;  %v4773_v54 = vsel %vm392_vm0, %v4058_v58, %v4107_v38 }
 0x27f   : > { %v2318_v50 = vperm.slane %v4773_v54, %v3750_v12 }
 0x280   : > { %v4760_v44 = vpop.permute.xlu2 %1544  ;;  %v4762_v27 = vpop.permute.xlu1 %1486 }
 0x281   : > { %6254 = vst [vmem:[#allocation89_spill] sm:$0xff] %v4760_v44  ;;  %2515 = vrot.lane.b32.xlu0 %v4758_v57, %s3524_s21  ;;  %v1889_v44 = vrot.slane %v4765_v8, 4 }
 0x283   : > { %v4775_v25 = vpop.permute.xlu0 %1608  ;;  %v1890_v38 = vsel %vm634_vm1, 0.0, %v1889_v44 }
 0x284   : > { %6255 = vst [vmem:[#allocation90_spill] sm:$0xff] %v4775_v25  ;;  %v2323_v25 = vrot.slane %v2318_v50, 4 }
 0x286   : > { %1672 = vrot.lane.b32.xlu1 %v4576_v41, %s3536_s29  ;;  %1680 = vrot.lane.b32.xlu2 %v1233_v23, %s3536_s29  ;;  %v2117_v41 = vrot.slane %v4791_v47, 4  ;;  %v2324_v53 = vsel %vm634_vm1, 0.0, %v2323_v25  ;;  %v1088_v25 = vrot.slane %v4549_v56, 4 }
 0x287   : > { %v4809_v43 = vperm.slane %v2324_v53, %v3758_v17  ;;  %v785_v53 = vsel %vm634_vm1, 0.0, %v784_v14 }
 0x288   : > { %v4785_v19 = vpop.permute.xlu2 %1550  ;;  %v4787_v58 = vpop.permute.xlu1 %1508 }
 0x289   : > { %2537 = vrot.lane.b32.xlu0 %v1890_v38, %s3525_s26  ;;  %v2118_v38 = vsel %vm634_vm1, 0.0, %v2117_v41  ;;  %v1089_v41 = vsel %vm634_vm1, 0.0, %v1088_v25 }
 0x28b   : > { %v4795_v1 = vpop.permute.xlu0 %1614 }
 0x28e   : > { %1702 = vrot.lane.b32.xlu2 %v861_v59, %s3537_s20  ;;  %1678 = vrot.lane.b32.xlu1 %v4594_v61, %s3536_s29  ;;  %v1933_v59 = vrot.slane %v4599_v22, 4  ;;  %v2345_v61 = vrot.slane %v4809_v43, 4 }
 0x290   : > { %v4803_v11 = vpop.permute.xlu2 %1572  ;;  %v4805_v44 = vpop.permute.xlu1 %1514  ;;  %v1934_v56 = vsel %vm634_vm1, 0.0, %v1933_v59  ;;  %v2346_v22 = vsel %vm634_vm1, 0.0, %v2345_v61  ;;  %v4840_v59 = vperm.slane %v2090_v48, %v3758_v17  ;;  %v1240_v48 = vrot.slane %v1233_v23, 4 }
 0x291   : > { %2543 = vrot.lane.b32.xlu0 %v2118_v38, %s3525_s26  ;;  %v4834_v25 = vperm.slane %v1934_v56, %v3750_v12  ;;  %v4871_v23 = vperm.slane %v2318_v50, %v3758_v17  ;;  %v2039_v50 = vrot.slane %v4868_v34, 4 }
 0x292   : > { %6259 = vst [vmem:[#allocation94_spill] sm:$0xff] %v4840_v59 }
 0x293   : > { %v4814_v42 = vpop.permute.xlu0 %1636  ;;  %6262 = vst [vmem:[#allocation97_spill] sm:$0xff] %v4871_v23  ;;  %v2040_v34 = vsel %vm634_vm1, 0.0, %v2039_v50 }
 0x294   : > { %6256 = vst [vmem:[#allocation91_spill] sm:$0xff] %v4814_v42  ;;  %v1012_v42 = vrot.slane %v1005_v49, 4  ;;  %v4848_v49 = vperm.slane %v4834_v25, %v3758_v17 }
 0x296   : > { %1708 = vrot.lane.b32.xlu2 %v1089_v41, %s3537_s20  ;;  %1700 = vrot.lane.b32.xlu1 %v785_v53, %s3537_s20  ;;  %v2161_v41 = vrot.slane %v4625_v4, 4  ;;  %v1888_v53 = vsel %vm634_vm1, 0.0, %v1887_v39  ;;  %6260 = vst [vmem:[#allocation95_spill] sm:$0xff] %v4848_v49  ;;  %v2389_v39 = vrot.slane %v4652_v40, 4 }
 0x298   : > { %v4826_v32 = vpop.permute.xlu2 %1578  ;;  %v4828_v38 = vpop.permute.xlu1 %1520  ;;  %v2162_v61 = vsel %vm634_vm1, 0.0, %v2161_v41  ;;  %v2009_v41 = vrot.slane %v4679_v63, 4 }
 0x299   : > { %6258 = vst [vmem:[#allocation93_spill] sm:$0xff] %v4828_v38  ;;  %2549 = vrot.lane.b32.xlu0 %v2346_v22, %s3525_s26  ;;  %v1013_v38 = vsel %vm634_vm1, 0.0, %v1012_v42  ;;  %v2115_v42 = vrot.slane %v4840_v59, 4  ;;  %v4859_v22 = vperm.slane %v2162_v61, %v3750_v12  ;;  %v2390_v61 = vsel %vm634_vm1, 0.0, %v2389_v39 }
 0x29a   : > { %v2010_v60 = vsel %vm634_vm1, 0.0, %v2009_v41  ;;  %v2237_v39 = vrot.slane %v4704_v46, 4  ;;  %v4901_v41 = vperm.slane %v4717_v6, %v3758_v17 }
 0x29b   : > { %v4836_v14 = vpop.permute.xlu0 %1642  ;;  %v2116_v59 = vsel %vm634_vm1, 0.0, %v2115_v42  ;;  %v4878_v40 = vperm.slane %v4859_v22, %v3758_v17  ;;  %v2343_v42 = vrot.slane %v4871_v23, 4 }
 0x29c   : > { %6265 = vst [vmem:[#allocation100_spill] sm:$0xff] %v4901_v41 }
 0x29d   : > { %6263 = vst [vmem:[#allocation98_spill] sm:$0xff] %v4878_v40  ;;  %v2344_v23 = vsel %vm634_vm1, 0.0, %v2343_v42 }
 0x29e   : > { %2473 = vrot.lane.b32.xlu2 %v1888_v53, %s3523_s17  ;;  %1706 = vrot.lane.b32.xlu1 %v1013_v38, %s3537_s20  ;;  %v1241_v53 = vsel %vm634_vm1, 0.0, %v1240_v48 }
 0x2a0   : > { %v4851_v56 = vpop.permute.xlu2 %1584  ;;  %v4853_v4 = vpop.permute.xlu1 %1542 }
 0x2a1   : > { %2571 = vrot.lane.b32.xlu0 %v4848_v49, %s3526_s2  ;;  %v4897_v49 = vperm.slane %v2010_v60, %v3750_v12 }
 0x2a3   : > { %v4861_v38 = vpop.permute.xlu0 %1648  ;;  %6264 = vst [vmem:[#allocation99_spill] sm:$0xff] %v4897_v49  ;;  %v4918_v6 = vperm.slane %v4897_v49, %v3758_v17 }
 0x2a6   : > { %1712 = vrot.lane.b32.xlu1 %v1241_v53, %s3537_s20  ;;  %2479 = vrot.lane.b32.xlu2 %v2116_v59, %s3523_s17  ;;  %v4891_v59 = vperm.slane %v2390_v61, %v3750_v12 }
 0x2a8   : > { %v4881_v63 = vpop.permute.xlu2 %1606  ;;  %v4883_v48 = vpop.permute.xlu1 %1548  ;;  %v4910_v46 = vperm.slane %v4891_v59, %v3758_v17 }
 0x2a9   : > { %2577 = vrot.lane.b32.xlu0 %v4878_v40, %s3526_s2  ;;  %v1943_v40 = vrot.slane %v4606_v26, 4  ;;  %v2238_v26 = vsel %vm634_vm1, 0.0, %v2237_v39  ;;  %v2043_v39 = vrot.slane %v4918_v6, 4 }
 0x2aa   : > { %6266 = vst [vmem:[#allocation101_spill] sm:$0xff] %v4910_v46 }
 0x2ab   : > { %v4893_v53 = vpop.permute.xlu0 %1670  ;;  %v1944_v50 = vsel %vm634_vm1, 0.0, %v1943_v40  ;;  %v2171_v40 = vrot.slane %v4633_v2, 4 }
 0x2ac   : > { %v4932_v49 = vperm.slane %v1944_v50, %v3758_v17 }
 0x2ae   : > { %2477 = vrot.lane.b32.xlu1 %v2040_v34, %s3523_s17  ;;  %2485 = vrot.lane.b32.xlu2 %v2344_v23, %s3523_s17  ;;  %v2267_v34 = vrot.slane %v4901_v41, 4  ;;  %v1857_v23 = vrot.slane %v4711_v37, 4 }
 0x2b0   : > { %v4912_v61 = vpop.permute.xlu2 %1612  ;;  %v4914_v60 = vpop.permute.xlu1 %1570  ;;  %v2268_v37 = vsel %vm634_vm1, 0.0, %v2267_v34 }
 0x2b1   : > { %6267 = vst [vmem:[#allocation102_spill] sm:$0xff] %v4912_v61  ;;  %2583 = vrot.lane.b32.xlu0 %v4910_v46, %s3526_s2  ;;  %v4929_v61 = vperm.slane %v2238_v26, %v3750_v12  ;;  %v1729_v46 = vsel %vm6166_vm2, %v3920_v9, %v4214_v13  ;;  %v1858_v26 = vsel %vm634_vm1, 0.0, %v1857_v23  ;;  %v2044_v9 = vsel %vm634_vm1, 0.0, %v2043_v39 }
 0x2b2   : > { %v1738_v41 = vsel %vm1731_vm3, %v1729_v46, %v4368_v29  ;;  %v2172_v29 = vsel %vm634_vm1, 0.0, %v2171_v40  ;;  %v4960_v34 = vperm.slane %v1858_v26, %v3750_v12  ;;  %v1724_v40 = vsel %vm6166_vm2, %v3879_v16, %v4154_v5 }
 0x2b3   : > { %v4926_v42 = vpop.permute.xlu0 %1676  ;;  %v4953_v13 = vperm.slane %v4929_v61, %v3758_v17  ;;  %v1747_v46 = vsel %vm1740_vm4, %v1738_v41, %v4226_v55  ;;  %v4972_v55 = vperm.slane %v2172_v29, %v3758_v17  ;;  %v2399_v26 = vrot.slane %v4660_v3, 4 }
 0x2b4   : > { %v1756_v23 = vsel %vm1749_vm5, %v1747_v46, %v4390_v15  ;;  %v1733_v15 = vsel %vm1731_vm3, %v1724_v40, %v4242_v33 }
 0x2b5   : > { %v1765_v39 = vsel %vm1758_vm6, %v1756_v23, %v4553_v45  ;;  %v2271_v41 = vrot.slane %v4953_v13, 4  ;;  %v1877_v45 = vrot.slane %v4960_v34, 4  ;;  %v1742_v46 = vsel %vm1740_vm4, %v1733_v15, %v4392_v10 }
 0x2b6   : > { %2483 = vrot.lane.b32.xlu1 %v2268_v37, %s3523_s17  ;;  %2507 = vrot.lane.b32.xlu2 %v4932_v49, %s3524_s21  ;;  %v1774_v16 = vsel %vm1767_vm7, %v1765_v39, %v4400_v0  ;;  %v2400_v0 = vsel %vm634_vm1, 0.0, %v2399_v26  ;;  %v1727_v23 = vsel %vm6166_vm2, %v3770_v20, %v4079_v36  ;;  %v2313_v20 = vrot.slane %v4773_v54, 4  ;;  %v6268_v36 = vld [vmem:[#allocation36_spill] sm:$0xff]  ;;  %v6271_v54 = vld [vmem:[#allocation26_spill] sm:$0xff]  ;;  %s3255_s17 = sshll.u32 %s3500_s9, 1 }
 0x2b7   : > { %v1783_v5 = vsel %vm1776_vm8, %v1774_v16, %v4570_v31  ;;  %v5018_v26 = vperm.slane %v2400_v0, %v3758_v17  ;;  %v6272_v16 = vld [vmem:[#allocation9_spill] sm:$0xff] }
 0x2b8   : > { %v4946_v50 = vpop.permute.xlu2 %1634  ;;  %v4948_v2 = vpop.permute.xlu1 %1576  ;;  %v1792_v33 = vsel %vm1785_vm9, %v1783_v5, %v4762_v27  ;;  %v1878_v27 = vsel %vm634_vm1, 0.0, %v1877_v45  ;;  %v6270_v45 = vld [vmem:[#allocation54_spill] sm:$0xff]  ;;  %v1730_v5 = vsel %vm6166_vm2, %v6272_v16, %v6271_v54  ;;  %v6279_v16 = vld [vmem:[#allocation41_spill] sm:$0xff] }
 0x2b9   : > { %2605 = vrot.lane.b32.xlu0 %v2044_v9, %s3527_s3  ;;  %v2085_v9 = vrot.slane %v4744_v7, 4  ;;  %v2272_v7 = vsel %vm634_vm1, 0.0, %v2271_v41  ;;  %v1801_v40 = vsel %vm1794_vm10, %v1792_v33, %v4580_v24  ;;  %v6269_v24 = vld [vmem:[#allocation53_spill] sm:$0xff] }
 0x2bb   : > { %v4966_v37 = vpop.permute.xlu0 %1698  ;;  %v2086_v29 = vsel %vm634_vm1, 0.0, %v2085_v9 }
 0x2bc   : > { %v5013_v41 = vperm.slane %v2086_v29, %v3750_v12 }
 0x2be   : > { %2505 = vrot.lane.b32.xlu1 %v4765_v8, %s3524_s21  ;;  %2513 = vrot.lane.b32.xlu2 %v4972_v55, %s3524_s21  ;;  %v1751_v8 = vsel %vm1749_vm5, %v1742_v46, %v4254_v21 }
 0x2bf   : > { %v1760_v31 = vsel %vm1758_vm6, %v1751_v8, %v4413_v35  ;;  %v1810_v35 = vsel %vm1803_vm11, %v1801_v40, %v4785_v19  ;;  %v5033_v19 = vperm.slane %v1878_v27, %v3758_v17  ;;  %v6273_v27 = vld [vmem:[#allocation39_spill] sm:$0xff] }
 0x2c0   : > { %v4992_v3 = vpop.permute.xlu2 %1640  ;;  %v1583_v10 = vpop.permute.xlu1 %1582  ;;  %v1769_v39 = vsel %vm1767_vm7, %v1760_v31, %v4572_v52  ;;  %v1736_v52 = vsel %vm1731_vm3, %v1727_v23, %v6268_v36  ;;  %v2314_v31 = vsel %vm634_vm1, 0.0, %v2313_v20  ;;  %v1739_v23 = vsel %vm1731_vm3, %v1730_v5, %v6273_v27 }
 0x2c1   : > { %2611 = vrot.lane.b32.xlu0 %v2272_v7, %s3527_s3  ;;  %v1819_v9 = vsel %vm1812_vm12, %v1810_v35, %v1583_v10  ;;  %v1745_v15 = vsel %vm1740_vm4, %v1736_v52, %v6269_v24  ;;  %v1778_v46 = vsel %vm1776_vm8, %v1769_v39, %v6270_v45  ;;  %v2041_v10 = vrot.slane %v4731_v62, 4  ;;  %v6276_v35 = vld [vmem:[#allocation56_spill] sm:$0xff] }
 0x2c2   : > { %v1787_v33 = vsel %vm1785_vm9, %v1778_v46, %v4588_v51  ;;  %v2105_v7 = vrot.slane %v5013_v41, 4  ;;  %v1828_v29 = vsel %vm1821_vm13, %v1819_v9, %v4795_v1  ;;  %v6274_v51 = vld [vmem:[#allocation38_spill] sm:$0xff]  ;;  %v1748_v1 = vsel %vm1740_vm4, %v1739_v23, %v6276_v35  ;;  %v6277_v45 = vld [vmem:[#allocation40_spill] sm:$0xff] }
 0x2c3   : > { %v5010_v21 = vpop.permute.xlu0 %1704  ;;  %v1754_v39 = vsel %vm1749_vm5, %v1745_v15, %v6274_v51  ;;  %v5067_v9 = vperm.slane %v2314_v31, %v3750_v12  ;;  %v6278_v46 = vld [vmem:[#allocation14_spill] sm:$0xff]  ;;  %v6283_v51 = vld [vmem:[#allocation28_spill] sm:$0xff] }
 0x2c4   : > { %v2106_v15 = vsel %vm634_vm1, 0.0, %v2105_v7  ;;  %v1725_v54 = vsel %vm6166_vm2, %v6278_v46, %v6277_v45  ;;  %v1953_v7 = vrot.slane %v4834_v25, 4  ;;  %v6288_v45 = vld [vmem:[#allocation76_spill] sm:$0xff] }
 0x2c5   : > { %v5093_v27 = vperm.slane %v2106_v15, %v3758_v17  ;;  %v2333_v23 = vrot.slane %v5067_v9, 4 }
 0x2c6   : > { %2511 = vrot.lane.b32.xlu1 %v4791_v47, %s3524_s21  ;;  %2519 = vrot.lane.b32.xlu2 %v5018_v26, %s3524_s21  ;;  %v1796_v47 = vsel %vm1794_vm10, %v1787_v33, %v4787_v58  ;;  %v6275_v58 = vld [vmem:[#allocation55_spill] sm:$0xff]  ;;  %v6280_v33 = vld [vmem:[#allocation58_spill] sm:$0xff] }
 0x2c7   : > { %v1763_v40 = vsel %vm1758_vm6, %v1754_v39, %v6275_v58  ;;  %v1805_v36 = vsel %vm1803_vm11, %v1796_v47, %v4602_v30  ;;  %v2042_v30 = vsel %vm634_vm1, 0.0, %v2041_v10  ;;  %v6282_v10 = vld [vmem:[#allocation73_spill] sm:$0xff]  ;;  %v6284_v58 = vld [vmem:[#allocation91_spill] sm:$0xff] }
 0x2c8   : > { %v1647_v0 = vpop.permute.xlu2 %1646  ;;  %v1605_v8 = vpop.permute.xlu1 %1604  ;;  %v1772_v20 = vsel %vm1767_vm7, %v1763_v40, %v4590_v28  ;;  %v1814_v24 = vsel %vm1812_vm12, %v1805_v36, %v4803_v11  ;;  %v1757_v28 = vsel %vm1749_vm5, %v1748_v1, %v6279_v16  ;;  %v2269_v11 = vrot.slane %v4758_v57, 4  ;;  %v6286_v36 = vld [vmem:[#allocation59_spill] sm:$0xff] }
 0x2c9   : > { %v5052_v62 = vsel %vm1830_vm14, %v1828_v29, %v1647_v0  ;;  %2633 = vrot.lane.b32.xlu0 %v5033_v19, %s3528_s4  ;;  %v1823_v5 = vsel %vm1821_vm13, %v1814_v24, %v1605_v8  ;;  %v1766_v47 = vsel %vm1758_vm6, %v1757_v28, %v6280_v33  ;;  %v6281_v0 = vld [vmem:[#allocation57_spill] sm:$0xff] }
 0x2ca   : > { %v1781_v29 = vsel %vm1776_vm8, %v1772_v20, %v6281_v0  ;;  %v1775_v31 = vsel %vm1767_vm7, %v1766_v47, %v6282_v10  ;;  %v1832_v25 = vsel %vm1830_vm14, %v1823_v5, %v6284_v58  ;;  %v1965_v20 = vrot.slane %v4932_v49, 4  ;;  %v6290_v49 = vld [vmem:[#allocation93_spill] sm:$0xff] }
 0x2cb   : > { %v5064_v52 = vpop.permute.xlu0 %1710  ;;  %v1790_v8 = vsel %vm1785_vm9, %v1781_v29, %v4617_v18  ;;  %v6285_v18 = vld [vmem:[#allocation42_spill] sm:$0xff]  ;;  %v2270_v5 = vsel %vm634_vm1, 0.0, %v2269_v11  ;;  %v2334_v47 = vsel %vm634_vm1, 0.0, %v2333_v23  ;;  %v1954_v0 = vsel %vm634_vm1, 0.0, %v1953_v7  ;;  %v6291_v29 = vld [vmem:[#allocation43_spill] sm:$0xff]  ;;  %v6295_v23 = vld [vmem:[#allocation77_spill] sm:$0xff] }
 0x2cc   : > { %v1799_v39 = vsel %vm1794_vm10, %v1790_v8, %v4805_v44  ;;  %v6287_v44 = vld [vmem:[#allocation60_spill] sm:$0xff]  ;;  %v6292_v8 = vld [vmem:[#allocation15_spill] sm:$0xff]  ;;  %v1966_v11 = vsel %vm634_vm1, 0.0, %v1965_v20 }
 0x2cd   : > { %v1784_v15 = vsel %vm1776_vm8, %v1775_v31, %v6287_v44  ;;  %v1728_v10 = vsel %vm6166_vm2, %v6292_v8, %v6291_v29  ;;  %v6293_v31 = vld [vmem:[#allocation44_spill] sm:$0xff]  ;;  %v6302_v8 = vld [vmem:[#allocation37_spill] sm:$0xff] }
 0x2ce   : > { %2517 = vrot.lane.b32.xlu1 %v4809_v43, %s3524_s21  ;;  %2541 = vrot.lane.b32.xlu2 %v2042_v30, %s3525_s26  ;;  %v1734_v43 = vsel %vm1731_vm3, %v1725_v54, %v6283_v51  ;;  %v1793_v46 = vsel %vm1785_vm9, %v1784_v15, %v6288_v45  ;;  %v6289_v54 = vld [vmem:[#allocation74_spill] sm:$0xff]  ;;  %v6298_v45 = vld [vmem:[#allocation45_spill] sm:$0xff]  ;;  %s3256_s21 = sshll.u32 %s3504_s10, 2 }
 0x2cf   : > { %v1743_v35 = vsel %vm1740_vm4, %v1734_v43, %v6285_v18  ;;  %v1808_v16 = vsel %vm1803_vm11, %v1799_v39, %v6289_v54  ;;  %v1802_v33 = vsel %vm1794_vm10, %v1793_v46, %v6290_v49  ;;  %v6294_v39 = vld [vmem:[#allocation61_spill] sm:$0xff]  ;;  %v2181_v18 = vrot.slane %v4859_v22, 4 }
 0x2d0   : > { %v1669_v57 = vpop.permute.xlu2 %1668  ;;  %v1611_v40 = vpop.permute.xlu1 %1610  ;;  %v1752_v24 = vsel %vm1749_vm5, %v1743_v35, %v6286_v36  ;;  %v1817_v30 = vsel %vm1812_vm12, %v1808_v16, %v4826_v32  ;;  %v6297_v35 = vld [vmem:[#allocation30_spill] sm:$0xff]  ;;  %v2193_v22 = vrot.slane %v4972_v55, 4 }
 0x2d1   : > { %v5105_v1 = vsel %vm6167_vm15, %v1832_v25, %v1669_v57  ;;  %2639 = vrot.lane.b32.xlu0 %v5093_v27, %s3528_s4  ;;  %v1761_v51 = vsel %vm1758_vm6, %v1752_v24, %v6293_v31  ;;  %v1826_v43 = vsel %vm1821_vm13, %v1817_v30, %v1611_v40  ;;  %v6296_v57 = vld [vmem:[#allocation78_spill] sm:$0xff]  ;;  %v5143_v25 = vperm.slane %v2334_v47, %v3758_v17  ;;  %v6300_v30 = vld [vmem:[#allocation63_spill] sm:$0xff] }
 0x2d2   : > { %v1770_v32 = vsel %vm1767_vm7, %v1761_v51, %v6294_v39  ;;  %v1811_v58 = vsel %vm1803_vm11, %v1802_v33, %v6296_v57  ;;  %v5146_v40 = vperm.slane %v1954_v0, %v3758_v17  ;;  %v1737_v20 = vsel %vm1731_vm3, %v1728_v10, %v6297_v35  ;;  %v6301_v33 = vld [vmem:[#allocation80_spill] sm:$0xff]  ;;  %v6303_v10 = vld [vmem:[#allocation13_spill] sm:$0xff] }
 0x2d3   : > { %v5118_v28 = vpop.permute.xlu0 %2475  ;;  %v1779_v7 = vsel %vm1776_vm8, %v1770_v32, %v6295_v23  ;;  %v1820_v36 = vsel %vm1812_vm12, %v1811_v58, %v4851_v56  ;;  %v1835_v44 = vsel %vm1830_vm14, %v1826_v43, %v4836_v14  ;;  %v1746_v46 = vsel %vm1740_vm4, %v1737_v20, %v6298_v45  ;;  %v6304_v43 = vld [vmem:[#allocation46_spill] sm:$0xff] }
 0x2d4   : > { %v1788_v14 = vsel %vm1785_vm9, %v1779_v7, %v6300_v30  ;;  %v1969_v29 = vrot.slane %v5146_v40, 4  ;;  %v1723_v55 = vsel %vm6166_vm2, %v6303_v10, %v6302_v8  ;;  %v5182_v51 = vperm.slane %v4960_v34, %v3758_v17  ;;  %v6306_v7 = vld [vmem:[#allocation64_spill] sm:$0xff]  ;;  %v6308_v58 = vld [vmem:[#allocation82_spill] sm:$0xff]  ;;  %v6311_v30 = vld [vmem:[#allocation65_spill] sm:$0xff] }
 0x2d5   : > { %v1797_v47 = vsel %vm1794_vm10, %v1788_v14, %v6301_v33  ;;  %v2194_v32 = vsel %vm634_vm1, 0.0, %v2193_v22  ;;  %v2182_v23 = vsel %vm634_vm1, 0.0, %v2181_v18  ;;  %v6312_v14 = vld [vmem:[#allocation66_spill] sm:$0xff]  ;;  %v6314_v10 = vld [vmem:[#allocation32_spill] sm:$0xff] }
 0x2d6   : > { %2547 = vrot.lane.b32.xlu2 %v2270_v5, %s3525_s26  ;;  %2539 = vrot.lane.b32.xlu1 %v1966_v11, %s3525_s26  ;;  %v6299_v5 = vld [vmem:[#allocation62_spill] sm:$0xff]  ;;  %v1806_v31 = vsel %vm1803_vm11, %v1797_v47, %v4853_v4  ;;  %v6305_v11 = vld [vmem:[#allocation47_spill] sm:$0xff]  ;;  %v6307_v4 = vld [vmem:[#allocation81_spill] sm:$0xff]  ;;  %v1970_v20 = vsel %vm634_vm1, 0.0, %v1969_v29 }
 0x2d7   : > { %v1755_v56 = vsel %vm1749_vm5, %v1746_v46, %v6299_v5  ;;  %v1815_v35 = vsel %vm1812_vm12, %v1806_v31, %v6308_v58  ;;  %v5206_v46 = vperm.slane %v2182_v23, %v3758_v17  ;;  %v6313_v29 = vld [vmem:[#allocation83_spill] sm:$0xff] }
 0x2d8   : > { %v1675_v24 = vpop.permute.xlu2 %1674  ;;  %v1617_v15 = vpop.permute.xlu1 %1616  ;;  %v1764_v39 = vsel %vm1758_vm6, %v1755_v56, %v6305_v11  ;;  %v6316_v11 = vld [vmem:[#allocation49_spill] sm:$0xff] }
 0x2d9   : > { %v5158_v54 = vsel %vm6167_vm15, %v1835_v44, %v1675_v24  ;;  %v1829_v16 = vsel %vm1821_vm13, %v1820_v36, %v1617_v15  ;;  %2645 = vrot.lane.b32.xlu0 %v5143_v25, %s3528_s4  ;;  %v1773_v57 = vsel %vm1767_vm7, %v1764_v39, %v6306_v7  ;;  %v2409_v36 = vrot.slane %v4891_v59, 4  ;;  %v6309_v24 = vld [vmem:[#allocation31_spill] sm:$0xff]  ;;  %v6317_v39 = vld [vmem:[#allocation50_spill] sm:$0xff] }
 0x2da   : > { %v1838_v49 = vsel %vm1830_vm14, %v1829_v16, %v4861_v38  ;;  %v1732_v38 = vsel %vm1731_vm3, %v1723_v55, %v6304_v43  ;;  %v1782_v34 = vsel %vm1776_vm8, %v1773_v57, %v6307_v4  ;;  %v1824_v44 = vsel %vm1821_vm13, %v1815_v35, %v4881_v63  ;;  %v6310_v16 = vld [vmem:[#allocation48_spill] sm:$0xff]  ;;  %v6318_v57 = vld [vmem:[#allocation67_spill] sm:$0xff]  ;;  %v6321_v35 = vld [vmem:[#allocation33_spill] sm:$0xff] }
 0x2db   : > { %v5172_v0 = vpop.permute.xlu0 %2481  ;;  %v1741_v18 = vsel %vm1740_vm4, %v1732_v38, %v6309_v24  ;;  %v2421_v59 = vrot.slane %v5018_v26, 4  ;;  %v1791_v33 = vsel %vm1785_vm9, %v1782_v34, %v6312_v14  ;;  %v6315_v55 = vld [vmem:[#allocation12_spill] sm:$0xff]  ;;  %v5233_v43 = vperm.slane %v5013_v41, %v3758_v17  ;;  %v6320_v34 = vld [vmem:[#allocation85_spill] sm:$0xff]  ;;  %v6322_v24 = vld [vmem:[#allocation102_spill] sm:$0xff] }
 0x2dc   : > { %v1750_v22 = vsel %vm1749_vm5, %v1741_v18, %v6310_v16  ;;  %v1800_v8 = vsel %vm1794_vm10, %v1791_v33, %v6313_v29  ;;  %v1726_v31 = vsel %vm6166_vm2, %v6315_v55, %v6314_v10  ;;  %v2197_v38 = vrot.slane %v5206_v46, 4  ;;  %v6323_v16 = vld [vmem:[#allocation51_spill] sm:$0xff]  ;;  %v6325_v14 = vld [vmem:[#allocation69_spill] sm:$0xff] }
 0x2dd   : > { %v1759_v63 = vsel %vm1758_vm6, %v1750_v22, %v6311_v30  ;;  %v1809_v26 = vsel %vm1803_vm11, %v1800_v8, %v4883_v48  ;;  %v2422_v23 = vsel %vm634_vm1, 0.0, %v2421_v59  ;;  %v2410_v7 = vsel %vm634_vm1, 0.0, %v2409_v36  ;;  %v6319_v48 = vld [vmem:[#allocation84_spill] sm:$0xff]  ;;  %v6326_v8 = vld [vmem:[#allocation86_spill] sm:$0xff] }
 0x2de   : > { %2569 = vrot.lane.b32.xlu2 %v5182_v51, %s3526_s2  ;;  %2545 = vrot.lane.b32.xlu1 %v2194_v32, %s3525_s26  ;;  %v1768_v32 = vsel %vm1767_vm7, %v1759_v63, %v6317_v39  ;;  %vm6168_vm2 = vcmask 244736   ;;  %v1818_v58 = vsel %vm1812_vm12, %v1809_v26, %v6320_v34  ;;  %v6324_v30 = vld [vmem:[#allocation68_spill] sm:$0xff]  ;;  %v6329_v39 = vld [vmem:[#allocation87_spill] sm:$0xff] }
 0x2df   : > { %v1777_v4 = vsel %vm1776_vm8, %v1768_v32, %v6318_v57  ;;  %v1827_v36 = vsel %vm1821_vm13, %v1818_v58, %v6322_v24  ;;  %v6330_v32 = vld [vmem:[#allocation88_spill] sm:$0xff]  ;;  %v6334_v24 = vld [vmem:[#allocation71_spill] sm:$0xff] }
 0x2e0   : > { %v1681_v15 = vpop.permute.xlu2 %1680  ;;  %v1639_v45 = vpop.permute.xlu1 %1638  ;;  %v1786_v41 = vsel %vm1785_vm9, %v1777_v4, %v6319_v48 }
 0x2e1   : > { %v5211_v5 = vsel %vm6167_vm15, %v1838_v49, %v1681_v15  ;;  %v1833_v56 = vsel %vm1830_vm14, %v1824_v44, %v1639_v45  ;;  %2667 = vrot.lane.b32.xlu0 %v1970_v20, %s3529_s5  ;;  %v2198_v15 = vsel %vm634_vm1, 0.0, %v2197_v38  ;;  %v5257_v45 = vperm.slane %v2410_v7, %v3758_v17  ;;  %v6327_v38 = vld [vmem:[#allocation52_spill] sm:$0xff]  ;;  %v6332_v7 = vld [vmem:[#allocation11_spill] sm:$0xff] }
 0x2e2   : > { %v1842_v47 = vsel %vm6167_vm15, %v1833_v56, %v4893_v53  ;;  %v1735_v53 = vsel %vm1731_vm3, %v1726_v31, %v6316_v11  ;;  %v1795_v33 = vsel %vm1794_vm10, %v1786_v41, %v6325_v14  ;;  %v5280_v31 = vperm.slane %v5067_v9, %v3758_v17  ;;  %v6337_v14 = vld [vmem:[#allocation34_spill] sm:$0xff] }
 0x2e3   : > { %v5224_v49 = vpop.permute.xlu0 %2487  ;;  %v1744_v20 = vsel %vm1740_vm4, %v1735_v53, %v6321_v35  ;;  %v1804_v10 = vsel %vm1803_vm11, %v1795_v33, %v6326_v8  ;;  %v2425_v26 = vrot.slane %v5257_v45, 4  ;;  %v6328_v53 = vld [vmem:[#allocation70_spill] sm:$0xff]  ;;  %v6333_v35 = vld [vmem:[#allocation95_spill] sm:$0xff]  ;;  %v6338_v33 = vld [vmem:[#allocation20_spill] sm:$0xff] }
 0x2e4   : > { %v1753_v22 = vsel %vm1749_vm5, %v1744_v20, %v6323_v16  ;;  %v1967_v20 = vrot.slane %v6333_v35, 4  ;;  %v6344_v35 = vld [vmem:[#allocation101_spill] sm:$0xff] }
 0x2e5   : > { %v1762_v63 = vsel %vm1758_vm6, %v1753_v22, %v6324_v30  ;;  %v2426_v34 = vsel %vm634_vm1, 0.0, %v2425_v26  ;;  %v6336_v30 = vld [vmem:[#allocation90_spill] sm:$0xff] }
 0x2e6   : > { %2575 = vrot.lane.b32.xlu2 %v5233_v43, %s3526_s2  ;;  %2551 = vrot.lane.b32.xlu1 %v2422_v23, %s3525_s26  ;;  %v1771_v11 = vsel %vm1767_vm7, %v1762_v63, %v6327_v38  ;;  %v6331_v23 = vld [vmem:[#allocation22_spill] sm:$0xff]  ;;  %s166_s26 = scalar_lea.vmem [#allocation5], %s3253_s30 }
 0x2e7   : > { %v5298_v57 = vsel %vm392_vm0, %v6332_v7, %v6331_v23 }
 0x2e8   : > { %v1703_v18 = vpop.permute.xlu2 %1702  ;;  %v1645_v44 = vpop.permute.xlu1 %1644 }
 0x2e9   : > { %v5262_v56 = vsel %vm6168_vm2, %v1842_v47, %v1703_v18  ;;  %v1836_v59 = vsel %vm1830_vm14, %v1827_v36, %v1645_v44  ;;  %2673 = vrot.lane.b32.xlu0 %v2198_v15, %s3529_s5  ;;  %v1813_v47 = vsel %vm1812_vm12, %v1804_v10, %v4914_v60  ;;  %v6335_v44 = vld [vmem:[#allocation89_spill] sm:$0xff] }
 0x2ea   : > { %v1845_v29 = vsel %vm6167_vm15, %v1836_v59, %v4926_v42  ;;  %v1780_v42 = vsel %vm1776_vm8, %v1771_v11, %v6328_v53  ;;  %v1822_v9 = vsel %vm1821_vm13, %v1813_v47, %v6330_v32  ;;  %v1968_v59 = vsel %vm634_vm1, 0.0, %v1967_v20  ;;  %v6339_v47 = vld [vmem:[#allocation27_spill] sm:$0xff]  ;;  %v6341_v11 = vld [vmem:[#allocation98_spill] sm:$0xff] }
 0x2eb   : > { %v5274_v55 = vpop.permute.xlu0 %2509  ;;  %v1789_v60 = vsel %vm1785_vm9, %v1780_v42, %v6329_v39  ;;  %v1831_v4 = vsel %vm1830_vm14, %v1822_v9, %v4946_v50  ;;  %v5317_v50 = vperm.slane %v5298_v57, %v3750_v12  ;;  %v2195_v53 = vrot.slane %v6341_v11, 4 }
 0x2ec   : > { %v1798_v36 = vsel %vm1794_vm10, %v1789_v60, %v6334_v24  ;;  %v1891_v42 = vrot.slane %v5182_v51, 4  ;;  %v2423_v20 = vrot.slane %v6344_v35, 4  ;;  %v2119_v24 = vrot.slane %v5233_v43, 4 }
 0x2ed   : > { %v1807_v15 = vsel %vm1803_vm11, %v1798_v36, %v6335_v44  ;;  %v2196_v9 = vsel %vm634_vm1, 0.0, %v2195_v53  ;;  %v2347_v11 = vrot.slane %v5280_v31, 4 }
 0x2ee   : > { %2581 = vrot.lane.b32.xlu2 %v5280_v31, %s3526_s2  ;;  %2573 = vrot.lane.b32.xlu1 %v4918_v6, %s3526_s2  ;;  %v1816_v22 = vsel %vm1812_vm12, %v1807_v15, %v4948_v2  ;;  %v1892_v23 = vsel %vm634_vm1, 0.0, %v1891_v42 }
 0x2ef   : > { %v1825_v63 = vsel %vm1821_vm13, %v1816_v22, %v6336_v30  ;;  %v2424_v30 = vsel %vm634_vm1, 0.0, %v2423_v20 }
 0x2f0   : > { %v1709_v48 = vpop.permute.xlu2 %1708  ;;  %v1667_v41 = vpop.permute.xlu1 %1666  ;;  %v1834_v2 = vsel %vm1830_vm14, %v1825_v63, %v4992_v3  ;;  %v2120_v63 = vsel %vm634_vm1, 0.0, %v2119_v24  ;;  %v6351_v24 = vld [vmem:[#allocation10_spill] sm:$0xff] }
 0x2f1   : > { %v5304_v6 = vsel %vm6168_vm2, %v1845_v29, %v1709_v48  ;;  %v1840_v58 = vsel %vm6167_vm15, %v1831_v4, %v1667_v41  ;;  %2679 = vrot.lane.b32.xlu0 %v2426_v34, %s3529_s5  ;;  %v5338_v29 = vsel %vm392_vm0, %v6338_v33, %v6337_v14  ;;  %v6342_v48 = vld [vmem:[#allocation24_spill] sm:$0xff]  ;;  %v6343_v41 = vld [vmem:[#allocation19_spill] sm:$0xff] }
 0x2f2   : > { %v5313_v18 = vsel %vm6168_vm2, %v1840_v58, %v4966_v37  ;;  %v5331_v37 = vperm.slane %v5317_v50, %v3758_v17  ;;  %v5360_v39 = vperm.slane %v5338_v29, %v3750_v12  ;;  %v5385_v34 = vsel %vm392_vm0, %v6343_v41, %v6342_v48  ;;  %v6348_v48 = vld [vmem:[#allocation72_spill] sm:$0xff] }
 0x2f3   : > { %v5321_v16 = vpop.permute.xlu0 %2515  ;;  %v5401_v15 = vperm.slane %v5385_v34, %v3750_v12 }
 0x2f6   : > { %2603 = vrot.lane.b32.xlu2 %v1968_v59, %s3527_s3  ;;  %2579 = vrot.lane.b32.xlu1 %v4953_v13, %s3526_s2  ;;  %v6340_v13 = vld [vmem:[#allocation17_spill] sm:$0xff] }
 0x2f7   : > { %v5347_v26 = vsel %vm392_vm0, %v6340_v13, %v6339_v47 }
 0x2f8   : > { %v5342_v8 = vpop.permute.xlu2 %2473  ;;  %v1673_v10 = vpop.permute.xlu1 %1672  ;;  %v5366_v32 = vperm.slane %v5347_v26, %v3750_v12 }
 0x2f9   : > { %v1843_v38 = vsel %vm6167_vm15, %v1834_v2, %v1673_v10  ;;  %2701 = vrot.lane.b32.xlu0 %v5331_v37, %s3530_s14  ;;  %v6346_v2 = vld [vmem:[#allocation35_spill] sm:$0xff]  ;;  %v6347_v10 = vld [vmem:[#allocation16_spill] sm:$0xff] }
 0x2fa   : > { %v5356_v3 = vsel %vm6168_vm2, %v1843_v38, %v5010_v21  ;;  %v5374_v21 = vperm.slane %v5360_v39, %v3758_v17  ;;  %v5378_v51 = vperm.slane %v5366_v32, %v3758_v17  ;;  %v5419_v47 = vsel %vm392_vm0, %v6347_v10, %v6346_v2  ;;  %v6352_v2 = vld [vmem:[#allocation75_spill] sm:$0xff] }
 0x2fb   : > { %v5362_v60 = vpop.permute.xlu0 %2537  ;;  %v5432_v42 = vperm.slane %v5419_v47, %v3750_v12 }
 0x2fc   : > { %v1925_v22 = vrot.slane %v5378_v51, 4 }
 0x2fd   : > { %v5445_v31 = vperm.slane %v5432_v42, %v3758_v17 }
 0x2fe   : > { %2609 = vrot.lane.b32.xlu2 %v2196_v9, %s3527_s3  ;;  %2601 = vrot.lane.b32.xlu1 %v1892_v23, %s3527_s3  ;;  %v1926_v33 = vsel %vm634_vm1, 0.0, %v1925_v22 }
 0x300   : > { %v5380_v7 = vpop.permute.xlu2 %2479  ;;  %v1679_v4 = vpop.permute.xlu1 %1678 }
 0x301   : > { %v1846_v58 = vsel %vm6167_vm15, %v5052_v62, %v1679_v4  ;;  %2707 = vrot.lane.b32.xlu0 %v5374_v21, %s3530_s14  ;;  %v6345_v62 = vld [vmem:[#allocation99_spill] sm:$0xff]  ;;  %v2348_v4 = vsel %vm634_vm1, 0.0, %v2347_v11  ;;  %vm6349_vm15 = vcmask 15360  }
 0x302   : > { %v5395_v36 = vsel %vm6168_vm2, %v1846_v58, %v5064_v52  ;;  %v2029_v59 = vrot.slane %v6345_v62, 4  ;;  %v5411_v52 = vperm.slane %v5401_v15, %v3758_v17  ;;  %v2946_v41 = vsel %vm6349_vm15, %v6348_v48, %v5118_v28 }
 0x303   : > { %v5397_v44 = vpop.permute.xlu0 %2543  ;;  %v2949_v10 = vsel %vm6349_vm15, %v6352_v2, %v5172_v0  ;;  %v1893_v0 = vrot.slane %v5033_v19, 4 }
 0x304   : > { %v2030_v38 = vsel %vm634_vm1, 0.0, %v2029_v59  ;;  %v2153_v23 = vrot.slane %v5411_v52, 4 }
 0x305   : > { %v5435_v9 = vperm.slane %v2030_v38, %v3758_v17 }
 0x306   : > { %2615 = vrot.lane.b32.xlu2 %v2424_v30, %s3527_s3  ;;  %2607 = vrot.lane.b32.xlu1 %v2120_v63, %s3527_s3  ;;  %v2154_v20 = vsel %vm634_vm1, 0.0, %v2153_v23 }
 0x308   : > { %v5413_v43 = vpop.permute.xlu2 %2485  ;;  %v1701_v14 = vpop.permute.xlu1 %1700 }
 0x309   : > { %v5423_v13 = vsel %vm6168_vm2, %v5105_v1, %v1701_v14  ;;  %2729 = vrot.lane.b32.xlu0 %v1926_v33, %s3531_s15  ;;  %v2257_v1 = vrot.slane %v4929_v61, 4  ;;  %v6350_v61 = vld [vmem:[#allocation29_spill] sm:$0xff]  ;;  %v2381_v33 = vrot.slane %v5445_v31, 4 }
 0x30a   : > { %v5454_v22 = vsel %vm392_vm0, %v6351_v24, %v6350_v61  ;;  %v1894_v61 = vsel %vm634_vm1, 0.0, %v1893_v0  ;;  %v6355_v24 = vld [vmem:[#allocation79_spill] sm:$0xff] }
 0x30b   : > { %v5428_v53 = vpop.permute.xlu0 %2549  ;;  %v2258_v28 = vsel %vm634_vm1, 0.0, %v2257_v1  ;;  %v5469_v63 = vperm.slane %v5454_v22, %v3750_v12  ;;  %v2382_v23 = vsel %vm634_vm1, 0.0, %v2381_v33  ;;  %v6353_v1 = vld [vmem:[#allocation25_spill] sm:$0xff] }
 0x30c   : > { %v5472_v14 = vperm.slane %v2258_v28, %v3758_v17  ;;  %v2952_v28 = vsel %vm6349_vm15, %v6355_v24, %v5224_v49 }
 0x30e   : > { %2637 = vrot.lane.b32.xlu2 %v5435_v9, %s3528_s4  ;;  %2613 = vrot.lane.b32.xlu1 %v2348_v4, %s3527_s3  ;;  %v6354_v4 = vld [vmem:[#allocation21_spill] sm:$0xff]  ;;  %s3142_s3 = sadd.s32 %s3256_s21, %s3255_s17 }
 0x30f   : > { %v5487_v48 = vsel %vm392_vm0, %v6354_v4, %v6353_v1  ;;  %v2121_v1 = vrot.slane %v5093_v27, 4 }
 0x310   : > { %v2508_v58 = vpop.permute.xlu2 %2507  ;;  %v1707_v35 = vpop.permute.xlu1 %1706 }
 0x311   : > { %v5457_v62 = vsel %vm1731_vm3, %v2946_v41, %v2508_v58  ;;  %v5461_v59 = vsel %vm6168_vm2, %v5158_v54, %v1707_v35  ;;  %2735 = vrot.lane.b32.xlu0 %v2154_v20, %s3531_s15  ;;  %v1981_v54 = vrot.slane %v5469_v63, 4  ;;  %v5502_v35 = vperm.slane %v5487_v48, %v3750_v12 }
 0x313   : > { %v5465_v30 = vpop.permute.xlu0 %2571  ;;  %v1982_v20 = vsel %vm634_vm1, 0.0, %v1981_v54  ;;  %v2209_v19 = vrot.slane %v5502_v35, 4  ;;  %v6357_v54 = vld [vmem:[#allocation18_spill] sm:$0xff] }
 0x316   : > { %2643 = vrot.lane.b32.xlu2 %v5472_v14, %s3528_s4  ;;  %2635 = vrot.lane.b32.xlu1 %v5146_v40, %s3528_s4 }
 0x318   : > { %v2514_v38 = vpop.permute.xlu2 %2513  ;;  %v1713_v11 = vpop.permute.xlu1 %1712 }
 0x319   : > { %v5490_v41 = vsel %vm1731_vm3, %v2949_v10, %v2514_v38  ;;  %v5494_v40 = vsel %vm6168_vm2, %v5211_v5, %v1713_v11  ;;  %2741 = vrot.lane.b32.xlu0 %v2382_v23, %s3531_s15  ;;  %v5510_v5 = vperm.slane %v1982_v20, %v3758_v17  ;;  %v6356_v10 = vld [vmem:[#allocation23_spill] sm:$0xff]  ;;  %vm6359_vm2 = vmmov %vm6349_vm15  ;;  %v2210_v20 = vsel %vm634_vm1, 0.0, %v2209_v19  ;;  %v6360_v19 = vld [vmem:[#allocation100_spill] sm:$0xff] }
 0x31a   : > { %v5519_v38 = vsel %vm392_vm0, %v6357_v54, %v6356_v10  ;;  %v5543_v27 = vperm.slane %v2210_v20, %v3758_v17  ;;  %vm6361_vm0 = vmmov %vm6359_vm2  ;;  %v2045_v54 = vrot.slane %v5435_v9, 4  ;;  %v6362_v9 = vld [vmem:[#allocation92_spill] sm:$0xff] }
 0x31b   : > { %v5498_v58 = vpop.permute.xlu0 %2577  ;;  %v5535_v0 = vperm.slane %v5519_v38, %v3750_v12  ;;  %vm6365_vm15 = vmmov %vm6361_vm0 }
 0x31c   : > { %v2046_v20 = vsel %vm634_vm1, 0.0, %v2045_v54  ;;  %v5589_v54 = vperm.slane %v5469_v63, %v3758_v17 }
 0x31d   : > { %v2437_v24 = vrot.slane %v5535_v0, 4 }
 0x31e   : > { %2665 = vrot.lane.b32.xlu2 %v1894_v61, %s3529_s5  ;;  %2641 = vrot.lane.b32.xlu1 %v5206_v46, %s3528_s4  ;;  %v6358_v46 = vld [vmem:[#allocation96_spill] sm:$0xff]  ;;  %v2122_v61 = vsel %vm634_vm1, 0.0, %v2121_v1 }
 0x320   : > { %v2520_v33 = vpop.permute.xlu2 %2519  ;;  %v2478_v2 = vpop.permute.xlu1 %2477 }
 0x321   : > { %v5522_v11 = vsel %vm1731_vm3, %v2952_v28, %v2520_v33  ;;  %v2947_v23 = vsel %vm6359_vm2, %v6358_v46, %v2478_v2  ;;  %2763 = vrot.lane.b32.xlu0 %v5510_v5, %s3532_s19  ;;  %vm6363_vm2 = vmmov %vm6361_vm0 }
 0x322   : > { %v2955_v49 = vsel %vm1731_vm3, %v2947_v23, %v5274_v55  ;;  %v2057_v55 = vrot.slane %v5317_v50, 4  ;;  %v2438_v23 = vsel %vm634_vm1, 0.0, %v2437_v24 }
 0x323   : > { %v5531_v4 = vpop.permute.xlu0 %2583 }
 0x324   : > { %v2058_v1 = vsel %vm634_vm1, 0.0, %v2057_v55  ;;  %v2285_v55 = vrot.slane %v5360_v39, 4 }
 0x325   : > { %v5573_v24 = vperm.slane %v2058_v1, %v3758_v17 }
 0x326   : > { %2671 = vrot.lane.b32.xlu2 %v2122_v61, %s3529_s5  ;;  %2647 = vrot.lane.b32.xlu1 %v5257_v45, %s3528_s4  ;;  %v2349_v45 = vrot.slane %v5143_v25, 4  ;;  %v5567_v25 = vperm.slane %v2438_v23, %v3758_v17  ;;  %s3257_s4 = sshll.u32 %s3142_s3, 3 }
 0x327   : > { %v2079_v39 = vrot.slane %v5573_v24, 4 }
 0x328   : > { %v2542_v28 = vpop.permute.xlu2 %2541  ;;  %v2484_v33 = vpop.permute.xlu1 %2483 }
 0x329   : > { %v5548_v2 = vsel %vm1740_vm4, %v2955_v49, %v2542_v28  ;;  %v2950_v10 = vsel %vm6361_vm0, %v6360_v19, %v2484_v33  ;;  %2769 = vrot.lane.b32.xlu0 %v5543_v27, %s3532_s19  ;;  %v2350_v49 = vsel %vm634_vm1, 0.0, %v2349_v45  ;;  %v2080_v63 = vsel %vm634_vm1, 0.0, %v2079_v39 }
 0x32a   : > { %v2958_v50 = vsel %vm1731_vm3, %v2950_v10, %v5321_v16  ;;  %v2945_v16 = vsel %vm6363_vm2, %v6362_v9, %v5342_v8  ;;  %v2273_v10 = vrot.slane %v5472_v14, 4  ;;  %v6364_v14 = vld [vmem:[#allocation94_spill] sm:$0xff] }
 0x32b   : > { %v5558_v46 = vpop.permute.xlu0 %2605 }
 0x32c   : > { %v2274_v23 = vsel %vm634_vm1, 0.0, %v2273_v10 }
 0x32e   : > { %2677 = vrot.lane.b32.xlu2 %v2350_v49, %s3529_s5  ;;  %2669 = vrot.lane.b32.xlu1 %v2046_v20, %s3529_s5 }
 0x330   : > { %v2548_v61 = vpop.permute.xlu2 %2547  ;;  %v2506_v28 = vpop.permute.xlu1 %2505 }
 0x331   : > { %v5577_v33 = vsel %vm1740_vm4, %v2958_v50, %v2548_v61  ;;  %v2953_v19 = vsel %vm1731_vm3, %v2945_v16, %v2506_v28  ;;  %2775 = vrot.lane.b32.xlu0 %v5567_v25, %s3532_s19  ;;  %v2286_v50 = vsel %vm634_vm1, 0.0, %v2285_v55  ;;  %v1895_v28 = vrot.slane %v5347_v26, 4 }
 0x332   : > { %v2961_v8 = vsel %vm1740_vm4, %v2953_v19, %v5362_v60  ;;  %v2948_v60 = vsel %vm6365_vm15, %v6364_v14, %v5380_v7  ;;  %v5602_v20 = vperm.slane %v2286_v50, %v3758_v17  ;;  %v5613_v7 = vperm.slane %v5502_v35, %v3758_v17 }
 0x333   : > { %v5585_v45 = vpop.permute.xlu0 %2611  ;;  %v1896_v10 = vsel %vm634_vm1, 0.0, %v1895_v28 }
 0x334   : > { %v2307_v55 = vrot.slane %v5602_v20, 4  ;;  %v5636_v14 = vperm.slane %v1896_v10, %v3750_v12  ;;  %v2351_v10 = vrot.slane %v5419_v47, 4 }
 0x336   : > { %2699 = vrot.lane.b32.xlu2 %v5589_v54, %s3530_s14  ;;  %2675 = vrot.lane.b32.xlu1 %v2274_v23, %s3529_s5  ;;  %v2308_v26 = vsel %vm634_vm1, 0.0, %v2307_v55  ;;  %v1971_v55 = vrot.slane %v5454_v22, 4  ;;  %s3144_s5 = scalar_lea.hbm %s6147_s1, %s3257_s4 }
 0x338   : > { %v2570_v1 = vpop.permute.xlu2 %2569  ;;  %v2512_v49 = vpop.permute.xlu1 %2511 }
 0x339   : > { %v5605_v9 = vsel %vm1749_vm5, %v2961_v8, %v2570_v1  ;;  %v2956_v16 = vsel %vm1731_vm3, %v2948_v60, %v2512_v49  ;;  %2797 = vrot.lane.b32.xlu0 %v2080_v63, %s3533_s23  ;;  %v2123_v60 = vrot.slane %v5385_v34, 4 }
 0x33a   : > { %v2964_v61 = vsel %vm1740_vm4, %v2956_v16, %v5397_v44  ;;  %v6366_v44 = vld [vmem:[#allocation97_spill] sm:$0xff] }
 0x33b   : > { %v5617_v19 = vpop.permute.xlu0 %2633  ;;  %v2951_v8 = vsel %vm6361_vm0, %v6366_v44, %v5413_v43  ;;  %v5640_v43 = vperm.slane %v5535_v0, %v3758_v17  ;;  %v2124_v49 = vsel %vm634_vm1, 0.0, %v2123_v60  ;;  %v2199_v60 = vrot.slane %v5487_v48, 4 }
 0x33c   : > { %v5665_v28 = vperm.slane %v2124_v49, %v3750_v12 }
 0x33e   : > { %2705 = vrot.lane.b32.xlu2 %v5613_v7, %s3530_s14  ;;  %2697 = vrot.lane.b32.xlu1 %v5378_v51, %s3530_s14 }
 0x340   : > { %v2576_v35 = vpop.permute.xlu2 %2575  ;;  %v2518_v39 = vpop.permute.xlu1 %2517 }
 0x341   : > { %v5629_v50 = vsel %vm1749_vm5, %v2964_v61, %v2576_v35  ;;  %v2959_v23 = vsel %vm1731_vm3, %v2951_v8, %v2518_v39  ;;  %2803 = vrot.lane.b32.xlu0 %v2308_v26, %s3533_s23  ;;  %v2001_v26 = vrot.slane %v5589_v54, 4  ;;  %vm3089_vm3 = vcmask 1040384  }
 0x342   : > { %v2967_v51 = vsel %vm1740_vm4, %v2959_v23, %v5428_v53  ;;  %v5651_v53 = vperm.slane %v5636_v14, %v3758_v17 }
 0x343   : > { %v5647_v1 = vpop.permute.xlu0 %2639 }
 0x346   : > { %2711 = vrot.lane.b32.xlu2 %v5640_v43, %s3530_s14  ;;  %2703 = vrot.lane.b32.xlu1 %v5411_v52, %s3530_s14  ;;  %v2077_v52 = vrot.slane %v5331_v37, 4  ;;  %v5675_v37 = vperm.slane %v5665_v28, %v3758_v17 }
 0x348   : > { %v2582_v63 = vpop.permute.xlu2 %2581  ;;  %v2540_v16 = vpop.permute.xlu1 %2539  ;;  %v2078_v44 = vsel %vm634_vm1, 0.0, %v2077_v52 }
 0x349   : > { %v5655_v0 = vsel %vm1749_vm5, %v2967_v51, %v2582_v63  ;;  %v2962_v34 = vsel %vm1740_vm4, %v5457_v62, %v2540_v16  ;;  %2825 = vrot.lane.b32.xlu0 %v5651_v53, %s3534_s18  ;;  %v1972_v62 = vsel %vm634_vm1, 0.0, %v1971_v55  ;;  %v2002_v16 = vsel %vm634_vm1, 0.0, %v2001_v26 }
 0x34a   : > { %v2970_v61 = vsel %vm1749_vm5, %v2962_v34, %v5465_v30  ;;  %v2352_v30 = vsel %vm634_vm1, 0.0, %v2351_v10  ;;  %v5697_v49 = vperm.slane %v1972_v62, %v3750_v12  ;;  %v2229_v55 = vrot.slane %v5613_v7, 4 }
 0x34b   : > { %v5679_v22 = vpop.permute.xlu0 %2645  ;;  %v5693_v51 = vperm.slane %v2352_v30, %v3750_v12  ;;  %v2427_v62 = vrot.slane %v5519_v38, 4 }
 0x34c   : > { %v5711_v34 = vperm.slane %v5697_v49, %v3758_v17 }
 0x34e   : > { %2733 = vrot.lane.b32.xlu2 %v2078_v44, %s3531_s15  ;;  %2709 = vrot.lane.b32.xlu1 %v5445_v31, %s3530_s14  ;;  %v2305_v31 = vrot.slane %v5374_v21, 4  ;;  %v5706_v21 = vperm.slane %v5693_v51, %v3758_v17  ;;  %s3145_s14 = sshll.u32 %s166_s26, 4  ;;  %s3146_s14 = int_to_ptr.vmem [resolvable:$true] %s3145_s14 }
 0x350   : > { %v2604_v8 = vpop.permute.xlu2 %2603  ;;  %v2546_v35 = vpop.permute.xlu1 %2545  ;;  %v2306_v63 = vsel %vm634_vm1, 0.0, %v2305_v31 }
 0x351   : > { %v5682_v47 = vsel %vm1758_vm6, %v2970_v61, %v2604_v8  ;;  %v2965_v39 = vsel %vm1740_vm4, %v5490_v41, %v2546_v35  ;;  %2831 = vrot.lane.b32.xlu0 %v5675_v37, %s3534_s18  ;;  %v1905_v41 = vrot.slane %v5366_v32, 4  ;;  %v2133_v35 = vrot.slane %v5401_v15, 4 }
 0x352   : > { %v2973_v23 = vsel %vm1749_vm5, %v2965_v39, %v5498_v58  ;;  %v2200_v58 = vsel %vm634_vm1, 0.0, %v2199_v60  ;;  %v2230_v39 = vsel %vm634_vm1, 0.0, %v2229_v55 }
 0x353   : > { %v1906_v32 = vsel %vm634_vm1, 0.0, %v1905_v41  ;;  %v5724_v44 = vpop.permute.xlu0 %2667  ;;  %v5728_v30 = vperm.slane %v2200_v58, %v3750_v12  ;;  %v2457_v41 = vrot.slane %v5640_v43, 4 }
 0x354   : > { %v5731_v8 = vperm.slane %v1906_v32, %v3758_v17  ;;  %v2361_v32 = vrot.slane %v5432_v42, 4 }
 0x355   : > { %v5743_v26 = vperm.slane %v5728_v30, %v3758_v17 }
 0x356   : > { %2739 = vrot.lane.b32.xlu2 %v2306_v63, %s3531_s15  ;;  %2731 = vrot.lane.b32.xlu1 %v2002_v16, %s3531_s15  ;;  %v2362_v42 = vsel %vm634_vm1, 0.0, %v2361_v32 }
 0x358   : > { %v2610_v48 = vpop.permute.xlu2 %2609  ;;  %v2552_v54 = vpop.permute.xlu1 %2551 }
 0x359   : > { %v5715_v52 = vsel %vm1758_vm6, %v2973_v23, %v2610_v48  ;;  %v2968_v61 = vsel %vm1740_vm4, %v5522_v11, %v2552_v54  ;;  %2837 = vrot.lane.b32.xlu0 %v5706_v21, %s3534_s18  ;;  %v2005_v11 = vrot.slane %v5711_v34, 4  ;;  %v2134_v23 = vsel %vm634_vm1, 0.0, %v2133_v35 }
 0x35a   : > { %v2976_v10 = vsel %vm1749_vm5, %v2968_v61, %v5531_v4  ;;  %v2428_v4 = vsel %vm634_vm1, 0.0, %v2427_v62  ;;  %v5759_v58 = vperm.slane %v2134_v23, %v3758_v17  ;;  %v2233_v48 = vrot.slane %v5743_v26, 4 }
 0x35b   : > { %v2006_v31 = vsel %vm634_vm1, 0.0, %v2005_v11  ;;  %v5756_v16 = vperm.slane %v2428_v4, %v3750_v12  ;;  %v2047_v54 = vrot.slane %v5298_v57, 4  ;;  %v2458_v61 = vsel %vm634_vm1, 0.0, %v2457_v41 }
 0x35c   : > { %v2234_v55 = vsel %vm634_vm1, 0.0, %v2233_v48  ;;  %v5789_v4 = vperm.slane %v2362_v42, %v3758_v17  ;;  %v1927_v42 = vrot.slane %v5731_v8, 4  ;;  %vm6368_vm4 = vcmask 244736  }
 0x35d   : > { %v2048_v57 = vsel %vm634_vm1, 0.0, %v2047_v54  ;;  %vm6376_vm2 = vmmov %vm6368_vm4 }
 0x35e   : > { %2761 = vrot.lane.b32.xlu2 %v5731_v8, %s3532_s19  ;;  %2737 = vrot.lane.b32.xlu1 %v2230_v39, %s3531_s15  ;;  %v5786_v39 = vperm.slane %v2048_v57, %v3750_v12  ;;  %vm6378_vm15 = vmmov %vm6376_vm2 }
 0x360   : > { %v2616_v38 = vpop.permute.xlu2 %2615  ;;  %v2574_v7 = vpop.permute.xlu1 %2573 }
 0x361   : > { %v5747_v15 = vsel %vm1758_vm6, %v2976_v10, %v2616_v38  ;;  %v2971_v60 = vsel %vm1749_vm5, %v5548_v2, %v2574_v7  ;;  %2859 = vrot.lane.b32.xlu0 %v2006_v31, %s3535_s24  ;;  %v5764_v2 = vpop.permute.xlu0 %2673  ;;  %v5773_v10 = vperm.slane %v5756_v16, %v3758_v17  ;;  %v2275_v7 = vrot.slane %v5338_v29, 4 }
 0x362   : > { %v2979_v63 = vsel %vm1758_vm6, %v2971_v60, %v5558_v46 }
 0x363   : > { %v2461_v38 = vrot.slane %v5773_v10, 4  ;;  %v2276_v41 = vsel %vm634_vm1, 0.0, %v2275_v7 }
 0x364   : > { %v5812_v54 = vperm.slane %v2276_v41, %v3750_v12  ;;  %v2155_v41 = vrot.slane %v5759_v58, 4 }
 0x365   : > { %v2462_v60 = vsel %vm634_vm1, 0.0, %v2461_v38  ;;  %v1928_v38 = vsel %vm634_vm1, 0.0, %v1927_v42 }
 0x366   : > { %2767 = vrot.lane.b32.xlu2 %v5759_v58, %s3532_s19  ;;  %2743 = vrot.lane.b32.xlu1 %v2458_v61, %s3531_s15  ;;  %s3147_s15 = sshll.u32 %s3144_s5, 4  ;;  %s3148_s15 = int_to_ptr.hbm [resolvable:$true] %s3147_s15 }
 0x368   : > { %v2638_v46 = vpop.permute.xlu2 %2637  ;;  %v2580_v43 = vpop.permute.xlu1 %2579 }
 0x369   : > { %v5778_v62 = vsel %vm1767_vm7, %v2979_v63, %v2638_v46  ;;  %v2974_v11 = vsel %vm1749_vm5, %v5577_v33, %v2580_v43  ;;  %2865 = vrot.lane.b32.xlu0 %v2234_v55, %s3535_s24  ;;  %v5797_v33 = vpop.permute.xlu0 %2679  ;;  %v2295_v46 = vrot.slane %v5812_v54, 4 }
 0x36a   : > { %v2982_v35 = vsel %vm1758_vm6, %v2974_v11, %v5585_v45  ;;  %v2067_v45 = vrot.slane %v5786_v39, 4 }
 0x36b   : > { %v2296_v11 = vsel %vm634_vm1, 0.0, %v2295_v46 }
 0x36c   : > { %v2068_v32 = vsel %vm634_vm1, 0.0, %v2067_v45  ;;  %v2459_v45 = vrot.slane %v5567_v25, 4 }
 0x36e   : > { %2773 = vrot.lane.b32.xlu2 %v5789_v4, %s3532_s19  ;;  %2765 = vrot.lane.b32.xlu1 %v5573_v24, %s3532_s19  ;;  %v2003_v24 = vrot.slane %v5510_v5, 4  ;;  %v1915_v5 = vrot.slane %v5636_v14, 4 }
 0x370   : > { %v2644_v31 = vpop.permute.xlu2 %2643  ;;  %v2602_v23 = vpop.permute.xlu1 %2601  ;;  %v2004_v61 = vsel %vm634_vm1, 0.0, %v2003_v24  ;;  %v1916_v7 = vsel %vm634_vm1, 0.0, %v1915_v5  ;;  %v2371_v5 = vrot.slane %v5693_v51, 4 }
 0x371   : > { %v5803_v63 = vsel %vm1767_vm7, %v2982_v35, %v2644_v31  ;;  %v2977_v29 = vsel %vm1758_vm6, %v5605_v9, %v2602_v23  ;;  %2871 = vrot.lane.b32.xlu0 %v2462_v60, %s3535_s24  ;;  %v5820_v9 = vperm.slane %v2068_v32, %v3758_v17  ;;  %v5824_v12 = vpop.permute.xlu0 %2701  ;;  %v2143_v31 = vrot.slane %v5665_v28, 4 }
 0x372   : > { %v2985_v48 = vsel %vm1767_vm7, %v2977_v29, %v5617_v19  ;;  %v2460_v28 = vsel %vm634_vm1, 0.0, %v2459_v45 }
 0x373   : > { %v2144_v32 = vsel %vm634_vm1, 0.0, %v2143_v31 }
 0x376   : > { %2795 = vrot.lane.b32.xlu2 %v2004_v61, %s3533_s23  ;;  %2771 = vrot.lane.b32.xlu1 %v5602_v20, %s3532_s19  ;;  %v2231_v20 = vrot.slane %v5543_v27, 4  ;;  %s3129_s19 = scalar_lea.sflag [#allocation4], %s3639_s28 }
 0x378   : > { %v2666_v19 = vpop.permute.xlu2 %2665  ;;  %v2608_v43 = vpop.permute.xlu1 %2607  ;;  %v2232_v35 = vsel %vm634_vm1, 0.0, %v2231_v20  ;;  %v2072_v20 = vperm.slane %v5786_v39, %v3758_v17 }
 0x379   : > { %v5827_v55 = vsel %vm1776_vm8, %v2985_v48, %v2666_v19  ;;  %v2980_v57 = vsel %vm1758_vm6, %v5629_v50, %v2608_v43  ;;  %2893 = vrot.lane.b32.xlu0 %v5820_v9, %s3536_s29  ;;  %v5844_v50 = vperm.slane %v2296_v11, %v3758_v17  ;;  %v5861_v25 = vpop.permute.xlu0 %2707  ;;  %v2156_v48 = vsel %vm634_vm1, 0.0, %v2155_v41 }
 0x37a   : > { %v2988_v14 = vsel %vm1767_vm7, %v2980_v57, %v5647_v1  ;;  %v5848_v1 = vperm.slane %v1916_v7, %v3758_v17  ;;  %v2383_v43 = vrot.slane %v5789_v4, 4  ;;  %v2372_v11 = vsel %vm634_vm1, 0.0, %v2371_v5 }
 0x37b   : > { %v2081_v5 = vrot.slane %v2072_v20, 4 }
 0x37c   : > { %v1931_v24 = vrot.slane %v5848_v1, 4  ;;  %v2384_v51 = vsel %vm634_vm1, 0.0, %v2383_v43  ;;  %v1991_v43 = vrot.slane %v5697_v49, 4 }
 0x37e   : > { %2801 = vrot.lane.b32.xlu2 %v2232_v35, %s3533_s23  ;;  %2793 = vrot.lane.b32.xlu1 %v1928_v38, %s3533_s23  ;;  %v1932_v58 = vsel %vm634_vm1, 0.0, %v1931_v24 }
 0x380   : > { %v2672_v27 = vpop.permute.xlu2 %2671  ;;  %v2614_v8 = vpop.permute.xlu1 %2613 }
 0x381   : > { %v5852_v23 = vsel %vm1776_vm8, %v2988_v14, %v2672_v27  ;;  %v2983_v60 = vsel %vm1758_vm6, %v5655_v0, %v2614_v8  ;;  %2899 = vrot.lane.b32.xlu0 %v5844_v50, %s3536_s29  ;;  %v2730_v14 = vpop.permute.xlu0 %2729  ;;  %v2300_v27 = vperm.slane %v5812_v54, %v3758_v17  ;;  %v1929_v54 = vrot.slane %v5651_v53, 4  ;;  %vm6370_vm6 = vmmov %vm6368_vm4 }
 0x382   : > { %v2991_v29 = vsel %vm1767_vm7, %v2983_v60, %v5679_v22  ;;  %v5871_v22 = vperm.slane %v2144_v32, %v3758_v17  ;;  %v2157_v53 = vrot.slane %v5675_v37, 4  ;;  %v2385_v37 = vrot.slane %v5706_v21, 4 }
 0x384   : > { %v2159_v42 = vrot.slane %v5871_v22, 4 }
 0x386   : > { %2807 = vrot.lane.b32.xlu2 %v2460_v28, %s3533_s23  ;;  %2799 = vrot.lane.b32.xlu1 %v2156_v48, %s3533_s23  ;;  %v2160_v4 = vsel %vm634_vm1, 0.0, %v2159_v42 }
 0x388   : > { %v2678_v0 = vpop.permute.xlu2 %2677  ;;  %v2636_v61 = vpop.permute.xlu1 %2635 }
 0x389   : > { %v5875_v46 = vsel %vm1776_vm8, %v2991_v29, %v2678_v0  ;;  %v2986_v19 = vsel %vm1767_vm7, %v5682_v47, %v2636_v61  ;;  %2921 = vrot.lane.b32.xlu0 %v1932_v58, %s3537_s20  ;;  %v2736_v45 = vpop.permute.xlu0 %2735  ;;  %v2158_v0 = vsel %vm634_vm1, 0.0, %v2157_v53 }
 0x38a   : > { %v2994_v57 = vsel %vm1776_vm8, %v2986_v19, %v5724_v44  ;;  %v5892_v44 = vperm.slane %v2372_v11, %v3758_v17 }
 0x38c   : > { %v2387_v8 = vrot.slane %v5892_v44, 4 }
 0x38e   : > { %2829 = vrot.lane.b32.xlu2 %v2072_v20, %s3534_s18  ;;  %2805 = vrot.lane.b32.xlu1 %v2384_v51, %s3533_s23  ;;  %v2309_v20 = vrot.slane %v2300_v27, 4  ;;  %s3432_s23 = sshra.s32 %s3148_s15, 4  ;;  %s3433_s23 = int_to_ptr.hbm [resolvable:$true] %s3432_s23 }
 0x38f   : > { %p3439_p7 = scmp.lt.s32.totalorder %s3433_s23, %s6147_s1 }
 0x390   : > { %v2700_v47 = vpop.permute.xlu2 %2699  ;;  %v2642_v35 = vpop.permute.xlu1 %2641 }
 0x391   : > { %v5895_v39 = vsel %vm1785_vm9, %v2994_v57, %v2700_v47  ;;  %v2989_v38 = vsel %vm1767_vm7, %v5715_v52, %v2642_v35  ;;  %2927 = vrot.lane.b32.xlu0 %v2160_v4, %s3537_s20  ;;  %v2388_v52 = vsel %vm634_vm1, 0.0, %v2387_v8  ;;  %v2742_v48 = vpop.permute.xlu0 %2741  ;;  %v2386_v57 = vsel %vm634_vm1, 0.0, %v2385_v37 }
 0x392   : > { %v2997_v7 = vsel %vm1776_vm8, %v2989_v38, %v5764_v2  ;;  %v2219_v47 = vrot.slane %v5728_v30, 4  ;;  %v2310_v4 = vsel %vm634_vm1, 0.0, %v2309_v20 }
 0x396   : > { %2835 = vrot.lane.b32.xlu2 %v2300_v27, %s3534_s18  ;;  %2827 = vrot.lane.b32.xlu1 %v5711_v34, %s3534_s18  ;;  %v1930_v34 = vsel %vm634_vm1, 0.0, %v1929_v54 }
 0x398   : > { %v2706_v31 = vpop.permute.xlu2 %2705  ;;  %v2648_v60 = vpop.permute.xlu1 %2647 }
 0x399   : > { %v5910_v41 = vsel %vm1785_vm9, %v2997_v7, %v2706_v31  ;;  %v2992_v2 = vsel %vm1767_vm7, %v5747_v15, %v2648_v60  ;;  %2933 = vrot.lane.b32.xlu0 %v2388_v52, %s3537_s20  ;;  %v2764_v19 = vpop.permute.xlu0 %2763  ;;  %v2447_v31 = vrot.slane %v5756_v16, 4 }
 0x39a   : > { %v3000_v29 = vsel %vm1776_vm8, %v2992_v2, %v5797_v33 }
 0x39e   : > { %2857 = vrot.lane.b32.xlu2 %v1930_v34, %s3535_s24  ;;  %2833 = vrot.lane.b32.xlu1 %v5743_v26, %s3534_s18 }
 0x3a0   : > { %v2712_v24 = vpop.permute.xlu2 %2711  ;;  %v2670_v28 = vpop.permute.xlu1 %2669 }
 0x3a1   : > { %v5923_v32 = vsel %vm1785_vm9, %v3000_v29, %v2712_v24  ;;  %v2995_v15 = vsel %vm1776_vm8, %v5778_v62, %v2670_v28  ;;  %v2770_v35 = vpop.permute.xlu0 %2769 }
 0x3a2   : > { %v3003_v33 = vsel %vm1785_vm9, %v2995_v15, %v5824_v12  ;;  %v2083_v15 = vrot.slane %v5820_v9, 4 }
 0x3a6   : > { %2863 = vrot.lane.b32.xlu2 %v2158_v0, %s3535_s24  ;;  %2839 = vrot.lane.b32.xlu1 %v5773_v10, %s3534_s18  ;;  %v2082_v10 = vsel %vm634_vm1, 0.0, %v2081_v5  ;;  %s3434_s18 = scalar_lea.hbm %s3433_s23, 16 }
 0x3a7   : > { %p3435_p3 = scmp.ne.s32.totalorder %s3433_s23, %s3434_s18 }
 0x3a8   : > { %v2734_v26 = vpop.permute.xlu2 %2733  ;;  %v2676_v61 = vpop.permute.xlu1 %2675 }
 0x3a9   : > { %v5935_v58 = vsel %vm1794_vm10, %v3003_v33, %v2734_v26  ;;  %v2998_v62 = vsel %vm1776_vm8, %v5803_v63, %v2676_v61  ;;  %v2776_v60 = vpop.permute.xlu0 %2775  ;;  %vm6372_vm8 = vmmov %vm6368_vm4  ;;  %p3436_p5 = pnand %p3435_p3, %p3614_p9 }
 0x3aa   : > { %v3006_v12 = vsel %vm1785_vm9, %v2998_v62, %v5861_v25  ;;  %v1992_v25 = vsel %vm634_vm1, 0.0, %v1991_v43 }
 0x3ab   : > { %v2000_v11 = vperm.slane %v1992_v25, %v3758_v17  ;;  %p3437_p6 = pneg %p3436_p5 }
 0x3ad   : > { %v2007_v9 = vrot.slane %v2000_v11, 4 }
 0x3ae   : > { %2869 = vrot.lane.b32.xlu2 %v2386_v57, %s3535_s24  ;;  %2861 = vrot.lane.b32.xlu1 %v2082_v10, %s3535_s24 }
 0x3af   : > { %v2008_v37 = vsel %vm634_vm1, 0.0, %v2007_v9 }
 0x3b0   : > { %v2740_v42 = vpop.permute.xlu2 %2739  ;;  %v2698_v51 = vpop.permute.xlu1 %2697 }
 0x3b1   : > { %v5948_v63 = vsel %vm1794_vm10, %v3006_v12, %v2740_v42  ;;  %v3001_v21 = vsel %vm1785_vm9, %v5827_v55, %v2698_v51  ;;  %v2798_v24 = vpop.permute.xlu0 %2797 }
 0x3b2   : > { %v3009_v49 = vsel %vm1794_vm10, %v3001_v21, %v2730_v14  ;;  %v2220_v14 = vsel %vm634_vm1, 0.0, %v2219_v47 }
 0x3b3   : > { %v2228_v30 = vperm.slane %v2220_v14, %v3758_v17 }
 0x3b6   : > { %2891 = vrot.lane.b32.xlu2 %v2000_v11, %s3536_s29  ;;  %2867 = vrot.lane.b32.xlu1 %v2310_v4, %s3535_s24 }
 0x3b8   : > { %v2762_v38 = vpop.permute.xlu2 %2761  ;;  %v2704_v7 = vpop.permute.xlu1 %2703 }
 0x3b9   : > { %v5960_v55 = vsel %vm1803_vm11, %v3009_v49, %v2762_v38  ;;  %v3004_v27 = vsel %vm1785_vm9, %v5852_v23, %v2704_v7  ;;  %v2804_v61 = vpop.permute.xlu0 %2803 }
 0x3ba   : > { %v3012_v8 = vsel %vm1794_vm10, %v3004_v27, %v2736_v45  ;;  %v2448_v45 = vsel %vm634_vm1, 0.0, %v2447_v31 }
 0x3bb   : > { %v2456_v16 = vperm.slane %v2448_v45, %v3758_v17  ;;  %v2084_v17 = vsel %vm634_vm1, 0.0, %v2083_v15 }
 0x3bd   : > { %v2463_v25 = vrot.slane %v2456_v16, 4 }
 0x3be   : > { %2897 = vrot.lane.b32.xlu2 %v2228_v30, %s3536_s29  ;;  %2889 = vrot.lane.b32.xlu1 %v5848_v1, %s3536_s29 }
 0x3c0   : > { %v2768_v52 = vpop.permute.xlu2 %2767  ;;  %v2710_v2 = vpop.permute.xlu1 %2709 }
 0x3c1   : > { %v5972_v54 = vsel %vm1803_vm11, %v3012_v8, %v2768_v52  ;;  %v3007_v23 = vsel %vm1785_vm9, %v5875_v46, %v2710_v2  ;;  %v2826_v43 = vpop.permute.xlu0 %2825 }
 0x3c2   : > { %v3015_v29 = vsel %vm1794_vm10, %v3007_v23, %v2742_v48 }
 0x3c6   : > { %2903 = vrot.lane.b32.xlu2 %v2456_v16, %s3536_s29  ;;  %2895 = vrot.lane.b32.xlu1 %v5871_v22, %s3536_s29 }
 0x3c8   : > { %v2774_v1 = vpop.permute.xlu2 %2773  ;;  %v2732_v34 = vpop.permute.xlu1 %2731 }
 0x3c9   : > { %v5983_v28 = vsel %vm1803_vm11, %v3015_v29, %v2774_v1  ;;  %v3010_v46 = vsel %vm1794_vm10, %v5895_v39, %v2732_v34  ;;  %v2311_v39 = vrot.slane %v5844_v50, 4  ;;  %v2832_v49 = vpop.permute.xlu0 %2831 }
 0x3ca   : > { %v3018_v48 = vsel %vm1803_vm11, %v3010_v46, %v2764_v19 }
 0x3cb   : > { %v2312_v62 = vsel %vm634_vm1, 0.0, %v2311_v39 }
 0x3ce   : > { %2925 = vrot.lane.b32.xlu2 %v2084_v17, %s3537_s20  ;;  %2901 = vrot.lane.b32.xlu1 %v5892_v44, %s3536_s29 }
 0x3d0   : > { %v2796_v22 = vpop.permute.xlu2 %2795  ;;  %v2738_v53 = vpop.permute.xlu1 %2737 }
 0x3d1   : > { %v5994_v33 = vsel %vm1812_vm12, %v3018_v48, %v2796_v22  ;;  %v3013_v0 = vsel %vm1794_vm10, %v5910_v41, %v2738_v53  ;;  %v2235_v41 = vrot.slane %v2228_v30, 4  ;;  %v2838_v27 = vpop.permute.xlu0 %2837 }
 0x3d2   : > { %v3021_v26 = vsel %vm1803_vm11, %v3013_v0, %v2770_v35 }
 0x3d3   : > { %v2236_v57 = vsel %vm634_vm1, 0.0, %v2235_v41 }
 0x3d6   : > { %2931 = vrot.lane.b32.xlu2 %v2312_v62, %s3537_s20  ;;  %2923 = vrot.lane.b32.xlu1 %v2008_v37, %s3537_s20 }
 0x3d8   : > { %v2802_v44 = vpop.permute.xlu2 %2801  ;;  %v2744_v5 = vpop.permute.xlu1 %2743 }
 0x3d9   : > { %v6005_v12 = vsel %vm1812_vm12, %v3021_v26, %v2802_v44  ;;  %v3016_v50 = vsel %vm1794_vm10, %v5923_v32, %v2744_v5  ;;  %v2464_v32 = vsel %vm634_vm1, 0.0, %v2463_v25  ;;  %v6023_v8 = vpop.permute.xlu0 %2859  ;;  %vm6367_vm1 = vcmask 228352   ;;  %vm6374_vm10 = vmmov %vm6368_vm4 }
 0x3da   : > { %v3024_v19 = vsel %vm1803_vm11, %v3016_v50, %v2776_v60  ;;  %vm6369_vm5 = vmmov %vm6367_vm1 }
 0x3db   : > { %vm6371_vm7 = vmmov %vm6367_vm1 }
 0x3dc   : > { %vm6373_vm9 = vmmov %vm6367_vm1 }
 0x3dd   : > { %vm6379_vm0 = vmmov %vm6367_vm1 }
 0x3de   : > { %2929 = vrot.lane.b32.xlu1 %v2236_v57, %s3537_s20 }
 0x3e0   : > { %v2808_v10 = vpop.permute.xlu2 %2807  ;;  %v2766_v42 = vpop.permute.xlu1 %2765 }
 0x3e1   : > { %v6013_v51 = vsel %vm1812_vm12, %v3024_v19, %v2808_v10  ;;  %v3019_v21 = vsel %vm1803_vm11, %v5935_v58, %v2766_v42  ;;  %v6025_v60 = vpop.permute.xlu0 %2865 }
 0x3e2   : > { %v3027_v20 = vsel %vm1812_vm12, %v3019_v21, %v2798_v24 }
 0x3e6   : > { %2935 = vrot.lane.b32.xlu1 %v2464_v32, %s3537_s20  ;;  %s3438_s20 = scalar_lea.hbm %s6147_s1, 64 }
 0x3e7   : > { %p3440_p8 = scmp.lt.s32.totalorder %s3438_s20, %s3434_s18 }
 0x3e8   : > { %v2830_v11 = vpop.permute.xlu2 %2829  ;;  %v2772_v47 = vpop.permute.xlu1 %2771 }
 0x3e9   : > { %v3022_v35 = vsel %vm1803_vm11, %v5948_v63, %v2772_v47  ;;  %v6027_v23 = vpop.permute.xlu0 %2871  ;;  %v3035_v15 = vsel %vm1821_vm13, %v3027_v20, %v2830_v11  ;;  %vm6375_vm11 = vmmov %vm6367_vm1  ;;  %p3441_p10 = por %p3440_p8, %p3439_p7 }
 0x3ea   : > { %v3030_v4 = vsel %vm1812_vm12, %v3022_v35, %v2804_v61 }
 0x3eb   : > { %p3442_p11 = pnand %p3441_p10, %p3437_p6 }
 0x3f0   : > { %v2836_v38 = vpop.permute.xlu2 %2835  ;;  %v2794_v7 = vpop.permute.xlu1 %2793 }
 0x3f1   : > { %v2894_v1 = vpop.permute.xlu0 %2893  ;;  %v3038_v9 = vsel %vm1821_vm13, %v3030_v4, %v2836_v38  ;;  %v3025_v26 = vsel %vm1812_vm12, %v5960_v55, %v2794_v7 }
 0x3f2   : > { %v3033_v44 = vsel %vm1821_vm13, %v3025_v26, %v2826_v43 }
 0x3f8   : > { %v2858_v14 = vpop.permute.xlu2 %2857  ;;  %v2800_v58 = vpop.permute.xlu1 %2799 }
 0x3f9   : > { %v2900_v46 = vpop.permute.xlu0 %2899  ;;  %v3041_v5 = vsel %vm1830_vm14, %v3033_v44, %v2858_v14  ;;  %v3028_v21 = vsel %vm1812_vm12, %v5972_v54, %v2800_v58 }
 0x3fa   : > { %v3036_v20 = vsel %vm1821_vm13, %v3028_v21, %v2832_v49 }
 0x400   : > { %v2864_v30 = vpop.permute.xlu2 %2863  ;;  %v2806_v31 = vpop.permute.xlu1 %2805 }
 0x401   : > { %v2922_v62 = vpop.permute.xlu0 %2921  ;;  %v3044_v11 = vsel %vm1830_vm14, %v3036_v20, %v2864_v30  ;;  %v3031_v54 = vsel %vm1812_vm12, %v5983_v28, %v2806_v31  ;;  %vm6377_vm12 = vmmov %vm6367_vm1 }
 0x408   : > { %v2870_v52 = vpop.permute.xlu2 %2869  ;;  %v2828_v2 = vpop.permute.xlu1 %2827 }
 0x409   : > { %v2928_v32 = vpop.permute.xlu0 %2927 }
 0x410   : > { %v2892_v45 = vpop.permute.xlu2 %2891  ;;  %v2834_v29 = vpop.permute.xlu1 %2833 }
 0x411   : > { %v2934_v14 = vpop.permute.xlu0 %2933 }
 0x418   : > { %v6029_v63 = vpop.permute.xlu2 %2897  ;;  %v6031_v16 = vpop.permute.xlu1 %2839 }
 0x420   : > { %v6033_v34 = vpop.permute.xlu2 %2903  ;;  %v2862_v24 = vpop.permute.xlu1 %2861 }
 0x421   : > { %v3043_v48 = vsel %vm1830_vm14, %v3035_v15, %v2862_v24  ;;  %v3034_v24 = vsel %vm1821_vm13, %v5994_v33, %v2828_v2  ;;  %v3037_v15 = vsel %vm1821_vm13, %v6005_v12, %v2834_v29  ;;  %v3040_v12 = vsel %vm1821_vm13, %v6013_v51, %v6031_v16 }
 0x422   : > { %v3051_v22 = vsel %vm6367_vm1, %v3043_v48, %v2894_v1  ;;  %vm6380_vm1 = vmmov %vm6376_vm2 }
 0x428   : > { %v2926_v17 = vpop.permute.xlu2 %2925  ;;  %v2868_v53 = vpop.permute.xlu1 %2867 }
 0x429   : > { %v3059_v0 = vsel %vm6368_vm4, %v3051_v22, %v2926_v17  ;;  %v3046_v37 = vsel %vm1830_vm14, %v3038_v9, %v2868_v53  ;;  %vm3125_vm4 = vcmask 261120  }
 0x42a   : > { %v3075_v39 = vrot.slane %v3059_v0, 7  ;;  %v3054_v41 = vsel %vm6369_vm5, %v3046_v37, %v2900_v46  ;;  %vm6381_vm5 = vmmov %vm6379_vm0 }
 0x42c   : > { %v3092_v61 = vsel %vm3089_vm3, %v5262_v56, %v3075_v39 }
 0x42d   : > { %3110 = vst [vmem:[#allocation1 + $0x2] ss:$4 sm:$0xff] %v3092_v61 }
 0x430   : > { %v2932_v50 = vpop.permute.xlu2 %2931  ;;  %v2890_v19 = vpop.permute.xlu1 %2889 }
 0x431   : > { %v3062_v57 = vsel %vm6370_vm6, %v3054_v41, %v2932_v50  ;;  %v3049_v10 = vsel %vm6371_vm7, %v3041_v5, %v2890_v19 }
 0x432   : > { %v3078_v55 = vrot.slane %v3062_v57, 7  ;;  %v3057_v42 = vsel %vm6372_vm8, %v3049_v10, %v2922_v62 }
 0x433   : > { %v3073_v56 = vrot.slane %v3057_v42, 7 }
 0x434   : > { %v3095_v43 = vsel %vm3089_vm3, %v5304_v6, %v3078_v55 }
 0x435   : > { %3116 = vst [vmem:[#allocation1 + $0x21] ss:$4 sm:$0xff] %v3095_v43  ;;  %v3090_v25 = vsel %vm3089_vm3, %v5313_v18, %v3073_v56  ;;  %v3039_v18 = vsel %vm1821_vm13, %v3031_v54, %v2838_v27  ;;  %vm6382_vm13 = vmmov %vm6380_vm1 }
 0x436   : > { %3106 = vst [vmem:[#allocation1] ss:$4 sm:$0xff] %v3090_v25  ;;  %v3047_v49 = vsel %vm1830_vm14, %v3039_v18, %v2870_v52 }
 0x438   : > { %v2896_v47 = vpop.permute.xlu1 %2895 }
 0x439   : > { %v3052_v35 = vsel %vm6373_vm9, %v3044_v11, %v2896_v47 }
 0x43a   : > { %v3060_v4 = vsel %vm6374_vm10, %v3052_v35, %v2928_v32 }
 0x43b   : > { %v3076_v38 = vrot.slane %v3060_v4, 7 }
 0x43d   : > { %v3093_v6 = vsel %vm3089_vm3, %v5356_v3, %v3076_v38  ;;  %v3042_v3 = vsel %vm1830_vm14, %v3034_v24, %v6023_v8 }
 0x43e   : > { %3112 = vst [vmem:[#allocation1 + $0x3] ss:$4 sm:$0xff] %v3093_v6  ;;  %v3050_v27 = vsel %vm6377_vm12, %v3042_v3, %v2892_v45 }
 0x440   : > { %v2902_v7 = vpop.permute.xlu1 %2901 }
 0x441   : > { %v3055_v58 = vsel %vm6375_vm11, %v3047_v49, %v2902_v7 }
 0x442   : > { %v3063_v30 = vsel %vm6376_vm2, %v3055_v58, %v2934_v14 }
 0x443   : > { %v3079_v1 = vrot.slane %v3063_v30, 7 }
 0x445   : > { %v3096_v28 = vsel %vm3089_vm3, %v5395_v36, %v3079_v1  ;;  %v3045_v36 = vsel %vm1830_vm14, %v3037_v15, %v6025_v60  ;;  %v3048_v60 = vsel %vm1830_vm14, %v3040_v12, %v6027_v23 }
 0x446   : > { %3118 = vst [vmem:[#allocation1 + $0x22] ss:$4 sm:$0xff] %v3096_v28  ;;  %v3053_v8 = vsel %vm6379_vm0, %v3045_v36, %v6029_v63  ;;  %v3056_v63 = vsel %vm6381_vm5, %v3048_v60, %v6033_v34 }
 0x448   : > { %v2924_v31 = vpop.permute.xlu1 %2923 }
 0x449   : > { %v3058_v52 = vsel %vm6378_vm15, %v3050_v27, %v2924_v31 }
 0x44a   : > { %v3074_v46 = vrot.slane %v3058_v52, 7 }
 0x44c   : > { %v3091_v33 = vsel %vm3089_vm3, %v5423_v13, %v3074_v46 }
 0x44d   : > { %3108 = vst [vmem:[#allocation1 + $0x1] ss:$4 sm:$0xff] %v3091_v33 }
 0x450   : > { %v2930_v2 = vpop.permute.xlu1 %2929 }
 0x451   : > { %v3061_v45 = vsel %vm6380_vm1, %v3053_v8, %v2930_v2 }
 0x452   : > { %v3077_v48 = vrot.slane %v3061_v45, 7 }
 0x454   : > { %v3094_v13 = vsel %vm3089_vm3, %v5461_v59, %v3077_v48  ;;  %v3121_v29 = vld.sshfl [vmem:[#allocation1] sm:$0xff pattern:$0x73625140] }
 0x455   : > { %3114 = vst [vmem:[#allocation1 + $0x20] ss:$4 sm:$0xff] %v3094_v13 }
 0x456   : > { %3126 = vst.msk [vmem:[%s166_s26] sm:$0xff] %vm3125_vm4, %v3121_v29 }
 0x458   : > { %v2936_v17 = vpop.permute.xlu1 %2935 }
 0x459   : > { %v3064_v51 = vsel %vm6382_vm13, %v3056_v63, %v2936_v17 }
 0x45a   : > { %v3080_v16 = vrot.slane %v3064_v51, 7 }
 0x45c   : > { %v3097_v59 = vsel %vm3089_vm3, %v5494_v40, %v3080_v16 }
 0x45d   : > { %3120 = vst [vmem:[#allocation1 + $0x23] ss:$4 sm:$0xff] %v3097_v59 }
 0x464   : > { %v3122_v23 = vld.sshfl [vmem:[#allocation1 + $0x20] sm:$0xff pattern:$0x73625140] }
 0x465   : > { %3127 = vst.msk [vmem:[%s166_s26 + $0x8] sm:$0xff] %vm3125_vm4, %v3122_v23 }
 0x466   : > { %3445 = shalt.err (!%p3442_p11)
}
 0x467   : > { %s3538_s28 = smov 128  }
 0x468   : > { %3262 = dma.vmem_to_hbm [thread:$0]  (%p3614_p9), %s3146_s14, 256, %s3148_s15, %s3129_s19, %s3538_s28, %s3538_s28, %s3526_s2  }
 0x469 PF: > { %p3273_p13 = scmp.ge.s32.totalorder %s3516_s13, 2  ;;  %s3162_s21 = sand.u32 1, %s3488_s6  }
 0x46a   : > { %s3163_s26 = scalar_lea.sflag [#allocation4], %s3162_s21 }
 0x46b   : > { %p3269_p0 = pnand %p3273_p13, %p3620_p12 }
 0x46d   : > { %p3270_p1 = pneg %p3269_p0 }
 0x46f   : > { %3483 = dma.done.wait (%p3270_p1), %s3163_s26, 256  }
 0x470   : > { %3485 = vsyncadd (%p3270_p1), %s3163_s26, 4294967040  ;;  %s17_s13 = sadd.s32 1, %s3516_s13   ;;  %s6383_s22 = sld [smem:[#allocation8_spill]] }
 0x471   : > { %p14_p2 = scmp.ge.s32.totalorder %s17_s13, 6   ;;  %s6384_s6 = smov %s3492_s7 }
 0x472   : > { %s6385_s7 = smov %s3496_s8  ;;  %s6386_s8 = smov %s3627_s27 }
 0x473   : > { %s6387_s9 = smov %s3508_s11  ;;  %s6388_s10 = smov %s3512_s12 }
 0x474   : > { %s6389_s11 = smov %s6392_s16  ;;  %16 = sbr.rel (!%p14_p2) target bundleno = 7 (0x7), region = 76 }
 0x476   : > { %s6390_s12 = smov %s6383_s22 }
 0x479   :  { %3169 = vsyncpa [#allocation3], 1 }
 0x47a   :  { %3171 = vsyncpa [#allocation3 + $0x1], 1 }
 0x47b   :  { %3172 = vsyncpa [#allocation4], 1 }
 0x47c   :  { %3174 = vsyncpa [#allocation4 + $0x1], 1 }

</bundles_post_ra>
